<compile_context>
chip_gen: v7x
topology: tpu7x:2x2x1
jax: 0.10.0
libtpu: 0.0.40
codegen_flags: <defaults>
</compile_context>

<pallas_src>
import functools
import math

import jax
import jax.numpy as jnp
from jax.experimental import pallas as pl
from jax.experimental.pallas import tpu as pltpu

_LANE = 128
_SUBLANE = 8


def _round_up(x, m):
    return ((x + m - 1) // m) * m


def _default_vmem_budget():
    """~3/4 of physical VMEM: ~48 MiB on v7x, ~96 MiB on v5e/v6e."""
    cap = 64 * 1024 * 1024  # conservative fallback (v7x per-core VMEM)
    try:
        info = pltpu.get_tpu_info()
        cap = int(getattr(info, "vmem_capacity_bytes", cap)) or cap
    except Exception:
        pass
    return (3 * cap) // 4


def _mlp_kernel(x_ref, w0_ref, b0_ref, w1_ref, b1_ref, w2_ref, b2_ref, o_ref,
                *, activation, discrim):
    """One batch tile: (x @ W0 + b0) -> act -> (@ W1 + b1) -> act -> (@ W2 + b2)."""

    def act(h):  # elementwise work in f32 (VPU/EUP friendly on all chips)
        if activation == "relu":
            return jnp.maximum(h, 0.0)
        if activation == "sigmoid":
            return jax.nn.sigmoid(h)
        return h

    # Layer 0: cast x to the MXU compute dtype in-kernel (free under the MXU).
    h = jnp.dot(x_ref[...].astype(w0_ref.dtype), w0_ref[...],
                preferred_element_type=jnp.float32)
    h = act(h + b0_ref[...])

    # Layer 1: cast only immediately before the dot; math stays f32.
    h = jnp.dot(h.astype(w1_ref.dtype), w1_ref[...],
                preferred_element_type=jnp.float32)
    h = act(h + b1_ref[...])

    # Layer 2 (no activation unless discrim).
    h = jnp.dot(h.astype(w2_ref.dtype), w2_ref[...],
                preferred_element_type=jnp.float32)
    h = h + b2_ref[...]
    if discrim:
        h = jax.nn.sigmoid(h)

    o_ref[...] = h.astype(o_ref.dtype)


def mlp_forward(x, params, *, activation="relu", discrim=False,
                block_b=4096, compute_dtype=jnp.bfloat16,
                vmem_budget_bytes=None):
    """x: [B, input_dim]; params: list of (W[in,out], b[1,out]) for 3 layers."""
    (w0, b0), (w1, b1), (w2, b2) = params
    B, in_dim = x.shape
    h0, h1 = w0.shape[1], w1.shape[1]
    out_dim = w2.shape[1]
    assert w0.shape[0] == in_dim and w1.shape[0] == h0 and w2.shape[0] == h1

    out_dtype = x.dtype
    cbytes = jnp.dtype(compute_dtype).itemsize
    xbytes = jnp.dtype(x.dtype).itemsize
    obytes = jnp.dtype(out_dtype).itemsize
    # Packed-sublane multiple for the batch-tile second-minor dim (16 for bf16).
    sub_mult = _SUBLANE * max(1, 4 // cbytes)

    if vmem_budget_bytes is None:
        vmem_budget_bytes = _default_vmem_budget()

    # --- Hidden dims padded to lane multiples (mathematically inert: the extra
    # weight cols/rows and bias lanes are zero, so padded activations multiply
    # by zero rows downstream). x / output are NOT padded along features. ------
    h0p = _round_up(h0, _LANE)
    h1p = _round_up(h1, _LANE)

    w0_p = jnp.pad(w0.astype(compute_dtype), ((0, 0), (0, h0p - h0)))
    b0_p = jnp.pad(b0.astype(jnp.float32), ((0, 0), (0, h0p - h0)))
    w1_p = jnp.pad(w1.astype(compute_dtype), ((0, h0p - h0), (0, h1p - h1)))
    b1_p = jnp.pad(b1.astype(jnp.float32), ((0, 0), (0, h1p - h1)))
    w2_p = jnp.pad(w2.astype(compute_dtype), ((0, h1p - h1), (0, 0)))
    b2_p = b2.astype(jnp.float32)

    # --- VMEM estimate (conservative: lane/sublane-padded VMEM layouts) -------
    in_l = _round_up(in_dim, _LANE)
    out_l = _round_up(out_dim, _LANE)

    def vmem_estimate(tb):
        io_tiles = 2 * tb * in_l * xbytes + 2 * tb * out_l * obytes  # dbl-buffered x/out
        weights = 2 * (_round_up(in_dim, sub_mult) * h0p + h0p * h1p
                       + h1p * out_l) * cbytes
        biases = 2 * (h0p + h1p + out_l) * 4
        inter = tb * (h0p + h1p) * (4 + cbytes) + tb * out_l * 4     # f32 intermediates + casts
        return io_tiles + weights + biases + inter

    # --- Batch tile: grow it until VMEM / block_b / batch caps it -------------
    tb_cap = _round_up(max(1, min(block_b, B)), sub_mult)
    # Keep >=2 grid steps when the batch allows, so the "parallel" batch axis
    # shards across both TensorCores on v7x (harmless on single-TC chips).
    tb_cap = min(tb_cap, max(sub_mult, _round_up(-(-B // 2), sub_mult)))
    tb = sub_mult
    while tb * 2 <= tb_cap and vmem_estimate(tb * 2) <= vmem_budget_bytes:
        tb *= 2
    if tb < tb_cap and vmem_estimate(tb_cap) <= vmem_budget_bytes:
        tb = tb_cap

    b_pad = _round_up(B, tb)
    x_p = x if b_pad == B else jnp.pad(x, ((0, b_pad - B), (0, 0)))
    grid = (b_pad // tb,)

    def const_spec(arr):  # whole array, resident across all grid steps
        return pl.BlockSpec(arr.shape, lambda i: (0,) * arr.ndim)

    kernel = functools.partial(_mlp_kernel, activation=activation, discrim=discrim)

    flops = 2 * b_pad * (in_dim * h0p + h0p * h1p + h1p * out_dim)
    transcendentals = 0
    if activation == "sigmoid":
        transcendentals += b_pad * (h0p + h1p)
    if discrim:
        transcendentals += b_pad * out_dim
    bytes_accessed = (b_pad * (in_dim * xbytes + out_dim * obytes)
                      + (in_dim * h0p + h0p * h1p + h1p * out_dim) * cbytes
                      + (h0p + h1p + out_dim) * 4)

    out = pl.pallas_call(
        kernel,
        out_shape=jax.ShapeDtypeStruct((b_pad, out_dim), out_dtype),
        grid=grid,
        in_specs=[
            # x tile: native dtype, full (unpadded) feature axis, double-buffered.
            pl.BlockSpec((tb, in_dim), lambda i: (i, 0)),
            const_spec(w0_p), const_spec(b0_p),
            const_spec(w1_p), const_spec(b1_p),
            const_spec(w2_p), const_spec(b2_p),
        ],
        # Unpadded output tile (full-dim last axis): no inflated writeback.
        out_specs=pl.BlockSpec((tb, out_dim), lambda i: (i, 0)),
        compiler_params=pltpu.CompilerParams(
            dimension_semantics=("parallel",),   # megacore sharding on v7x
            vmem_limit_bytes=int(vmem_budget_bytes),
        ),
        cost_estimate=pl.CostEstimate(
            flops=flops, transcendentals=transcendentals,
            bytes_accessed=bytes_accessed),
    )(x_p, w0_p, b0_p, w1_p, b1_p, w2_p, b2_p)

    return out if b_pad == B else out[:B]


def init_mlp_params(key, input_dim, output_dim, hidden_size=(1024, 512),
                    dtype=jnp.float32):
    """Deterministic init mimicking nn.Linear's U(-1/sqrt(fan_in), 1/sqrt(fan_in))."""
    dims = [input_dim, *hidden_size, output_dim]
    params = []
    for i in range(len(dims) - 1):
        key, kw, kb = jax.random.split(key, 3)
        fan_in, fan_out = dims[i], dims[i + 1]
        bound = 1.0 / math.sqrt(fan_in)
        # Stored as [in, out] (transpose of PyTorch's [out, in]) for x @ W.
        w = jax.random.uniform(kw, (fan_in, fan_out), dtype, -bound, bound)
        b = jax.random.uniform(kb, (1, fan_out), dtype, -bound, bound)
        params.append((w, b))
    return params


def mlp_reference(x, params, *, activation="relu", discrim=False):
    """Pure-JAX reference mirroring the PyTorch forward (full-precision dots)."""
    n = len(params)
    for i, (w, b) in enumerate(params):
        x = jnp.dot(x, w, precision=jax.lax.Precision.HIGHEST) + b
        if i != n - 1:
            x = jnp.maximum(x, 0.0) if activation == "relu" else jax.nn.sigmoid(x)
            # TODO(synk): dropout (train-mode RNG masking) not applied; module
            # default dropout=-1 disables it anyway.
        elif discrim:
            x = jax.nn.sigmoid(x)
    return x


if __name__ == "__main__":
    key = jax.random.PRNGKey(0)
    k_x, k_p = jax.random.split(key)

    B, input_dim, output_dim = 8, 32, 16
    hidden_size = (1024, 512)   # module defaults

    x = jax.random.normal(k_x, (B, input_dim), jnp.float32)
    params = init_mlp_params(k_p, input_dim, output_dim, hidden_size)
    ref = mlp_reference(x, params, activation="relu", discrim=False)

    # f32 compute path (tight-ish tolerance vs full-precision reference).
    out_f32 = mlp_forward(x, params, activation="relu", discrim=False,
                          compute_dtype=jnp.float32)
    out_f32 = jax.block_until_ready(out_f32)
    assert out_f32.shape == (B, output_dim), out_f32.shape
    assert jnp.allclose(out_f32, ref, atol=1e-3, rtol=1e-3), "f32 mismatch vs reference"

    # Default bf16 MXU path (f32 accumulation) -- looser tolerance.
    out_bf16 = mlp_forward(x, params, activation="relu", discrim=False)
    out_bf16 = jax.block_until_ready(out_bf16)
    assert out_bf16.shape == (B, output_dim), out_bf16.shape
    assert jnp.allclose(out_bf16, ref, atol=5e-2, rtol=5e-2), \
        "bf16 mismatch vs reference"

    print("KERNEL_OK")
</pallas_src>

<mosaic_0001>
module attributes {stable_mosaic.version = 11 : i64} {
  func.func @_mlp_kernel(%arg0: i32, %arg1: memref<8x32xf32, #tpu.memory_space<vmem>>, %arg2: memref<32x1024xf32, #tpu.memory_space<vmem>>, %arg3: memref<1x1024xf32, #tpu.memory_space<vmem>>, %arg4: memref<1024x512xf32, #tpu.memory_space<vmem>>, %arg5: memref<1x512xf32, #tpu.memory_space<vmem>>, %arg6: memref<512x16xf32, #tpu.memory_space<vmem>>, %arg7: memref<1x16xf32, #tpu.memory_space<vmem>>, %arg8: memref<8x16xf32, #tpu.memory_space<vmem>>) attributes {dimension_semantics = [#tpu.dimension_semantics<parallel>], iteration_bounds = array<i64: 1>, scalar_prefetch = 0 : i64, scratch_operands = 0 : i64, tpu.core_type = #tpu.core_type<tc>, window_params = [{transform_indices = @transform_0, window_bounds = array<i64: 8, 32>}, {pipeline_mode = #tpu.pipeline_mode<synchronous>, transform_indices = @transform_1, window_bounds = array<i64: 32, 1024>}, {pipeline_mode = #tpu.pipeline_mode<synchronous>, transform_indices = @transform_2, window_bounds = array<i64: 1, 1024>}, {pipeline_mode = #tpu.pipeline_mode<synchronous>, transform_indices = @transform_3, window_bounds = array<i64: 1024, 512>}, {pipeline_mode = #tpu.pipeline_mode<synchronous>, transform_indices = @transform_4, window_bounds = array<i64: 1, 512>}, {pipeline_mode = #tpu.pipeline_mode<synchronous>, transform_indices = @transform_5, window_bounds = array<i64: 512, 16>}, {pipeline_mode = #tpu.pipeline_mode<synchronous>, transform_indices = @transform_6, window_bounds = array<i64: 1, 16>}, {transform_indices = @transform_7, window_bounds = array<i64: 8, 16>}]} {
    %c0 = arith.constant 0 : index
    %c0_0 = arith.constant 0 : index
    %0 = vector.load %arg1[%c0, %c0_0] : memref<8x32xf32, #tpu.memory_space<vmem>>, vector<8x32xf32>
    %c0_1 = arith.constant 0 : index
    %c0_2 = arith.constant 0 : index
    %1 = vector.load %arg2[%c0_1, %c0_2] : memref<32x1024xf32, #tpu.memory_space<vmem>>, vector<32x1024xf32>
    %cst = arith.constant dense<0.000000e+00> : vector<8x1024xf32>
    %2 = tpu.matmul %0, %1, %cst {dimension_numbers = #tpu.dot_dimension_numbers<[1], [0], [0], [1], [0, 0, 1, 1], [], []>} : vector<8x32xf32>, vector<32x1024xf32>, vector<8x1024xf32> -> vector<8x1024xf32>
    %c0_3 = arith.constant 0 : index
    %c0_4 = arith.constant 0 : index
    %3 = vector.load %arg3[%c0_3, %c0_4] : memref<1x1024xf32, #tpu.memory_space<vmem>>, vector<1x1024xf32>
    %4 = vector.broadcast %3 : vector<1x1024xf32> to vector<8x1024xf32>
    %5 = arith.addf %2, %4 : vector<8x1024xf32>
    %cst_5 = arith.constant 0.000000e+00 : f32
    %6 = vector.broadcast %cst_5 : f32 to vector<8x1024xf32>
    %7 = arith.maximumf %5, %6 : vector<8x1024xf32>
    %c0_6 = arith.constant 0 : index
    %c0_7 = arith.constant 0 : index
    %8 = vector.load %arg4[%c0_6, %c0_7] : memref<1024x512xf32, #tpu.memory_space<vmem>>, vector<1024x512xf32>
    %cst_8 = arith.constant dense<0.000000e+00> : vector<8x512xf32>
    %9 = tpu.matmul %7, %8, %cst_8 {dimension_numbers = #tpu.dot_dimension_numbers<[1], [0], [0], [1], [0, 0, 1, 1], [], []>} : vector<8x1024xf32>, vector<1024x512xf32>, vector<8x512xf32> -> vector<8x512xf32>
    %c0_9 = arith.constant 0 : index
    %c0_10 = arith.constant 0 : index
    %10 = vector.load %arg5[%c0_9, %c0_10] : memref<1x512xf32, #tpu.memory_space<vmem>>, vector<1x512xf32>
    %11 = vector.broadcast %10 : vector<1x512xf32> to vector<8x512xf32>
    %12 = arith.addf %9, %11 : vector<8x512xf32>
    %cst_11 = arith.constant 0.000000e+00 : f32
    %13 = vector.broadcast %cst_11 : f32 to vector<8x512xf32>
    %14 = arith.maximumf %12, %13 : vector<8x512xf32>
    %c0_12 = arith.constant 0 : index
    %c0_13 = arith.constant 0 : index
    %15 = vector.load %arg6[%c0_12, %c0_13] : memref<512x16xf32, #tpu.memory_space<vmem>>, vector<512x16xf32>
    %cst_14 = arith.constant dense<0.000000e+00> : vector<8x16xf32>
    %16 = tpu.matmul %14, %15, %cst_14 {dimension_numbers = #tpu.dot_dimension_numbers<[1], [0], [0], [1], [0, 0, 1, 1], [], []>} : vector<8x512xf32>, vector<512x16xf32>, vector<8x16xf32> -> vector<8x16xf32>
    %c0_15 = arith.constant 0 : index
    %c0_16 = arith.constant 0 : index
    %17 = vector.load %arg7[%c0_15, %c0_16] : memref<1x16xf32, #tpu.memory_space<vmem>>, vector<1x16xf32>
    %18 = vector.broadcast %17 : vector<1x16xf32> to vector<8x16xf32>
    %19 = arith.addf %16, %18 : vector<8x16xf32>
    %c0_17 = arith.constant 0 : index
    %c0_18 = arith.constant 0 : index
    %20 = vector.load %arg8[%c0_17, %c0_18] : memref<8x16xf32, #tpu.memory_space<vmem>>, vector<8x16xf32>
    tpu.vector_store %arg8[%c0_17, %c0_18], %19 {strides = array<i32>} : memref<8x16xf32, #tpu.memory_space<vmem>>, vector<8x16xf32>,
    return
  }
  func.func @transform_0(%arg0: i32) -> (i32, i32) {
    %c0_i32 = arith.constant 0 : i32
    %c0_i32_0 = arith.constant 0 : i32
    return %arg0, %c0_i32 : i32, i32
  }
  func.func @transform_1(%arg0: i32) -> (i32, i32) {
    %c0_i32 = arith.constant 0 : i32
    %c0_i32_0 = arith.constant 0 : i32
    %c0_i32_1 = arith.constant 0 : i32
    return %c0_i32, %c0_i32_0 : i32, i32
  }
  func.func @transform_2(%arg0: i32) -> (i32, i32) {
    %c0_i32 = arith.constant 0 : i32
    %c0_i32_0 = arith.constant 0 : i32
    %c0_i32_1 = arith.constant 0 : i32
    return %c0_i32, %c0_i32_0 : i32, i32
  }
  func.func @transform_3(%arg0: i32) -> (i32, i32) {
    %c0_i32 = arith.constant 0 : i32
    %c0_i32_0 = arith.constant 0 : i32
    %c0_i32_1 = arith.constant 0 : i32
    return %c0_i32, %c0_i32_0 : i32, i32
  }
  func.func @transform_4(%arg0: i32) -> (i32, i32) {
    %c0_i32 = arith.constant 0 : i32
    %c0_i32_0 = arith.constant 0 : i32
    %c0_i32_1 = arith.constant 0 : i32
    return %c0_i32, %c0_i32_0 : i32, i32
  }
  func.func @transform_5(%arg0: i32) -> (i32, i32) {
    %c0_i32 = arith.constant 0 : i32
    %c0_i32_0 = arith.constant 0 : i32
    %c0_i32_1 = arith.constant 0 : i32
    return %c0_i32, %c0_i32_0 : i32, i32
  }
  func.func @transform_6(%arg0: i32) -> (i32, i32) {
    %c0_i32 = arith.constant 0 : i32
    %c0_i32_0 = arith.constant 0 : i32
    %c0_i32_1 = arith.constant 0 : i32
    return %c0_i32, %c0_i32_0 : i32, i32
  }
  func.func @transform_7(%arg0: i32) -> (i32, i32) {
    %c0_i32 = arith.constant 0 : i32
    %c0_i32_0 = arith.constant 0 : i32
    return %arg0, %c0_i32 : i32, i32
  }
}

</mosaic_0001>

<bundles_post_ra>
// kernel: tpu_custom_call.1
= control target key start
LH: loop header
LB: loop body
LE: loop exit
PB: predicated region body
PF: predicated region fallthrough
CT: control target
= control target key end

     0   :  { %12 = vsyncpa [#allocation3], 0  ;;  %s3080_s0 = inlined_call_operand.hbm [shape: f32[8,32], index: 0, kind: input, shape index: {}]   ;;  %s3081_s1 = inlined_call_operand.hbm [shape: f32[32,1024], index: 1, kind: input, shape index: {}]   ;;  %s3082_s2 = inlined_call_operand.hbm [shape: f32[1,1024], index: 2, kind: input, shape index: {}]   ;;  %s3083_s3 = inlined_call_operand.hbm [shape: f32[1024,512], index: 3, kind: input, shape index: {}]   ;;  %s3084_s4 = inlined_call_operand.hbm [shape: f32[1,512], index: 4, kind: input, shape index: {}]   ;;  %s3085_s5 = inlined_call_operand.vmem [shape: f32[512,16], index: 5, kind: input, shape index: {}]   ;;  %s3086_s6 = inlined_call_operand.hbm [shape: f32[1,16], index: 6, kind: input, shape index: {}]   ;;  %s3087_s7 = inlined_call_operand.hbm [shape: f32[8,16], index: 7, kind: output, shape index: {}]  }
   0x1   :  { %13 = vsyncpa [#allocation6], 0 }
   0x2   :  { %14 = vsyncpa [#allocation9], 0 }
   0x3   :  { %15 = vsyncpa [#allocation12], 0 }
   0x4   :  { %16 = vsyncpa [#allocation4], 0  ;;  %s2685_s24 = smov [#allocation5]   ;;  %s2521_s28 = scalar_lea.hbm %s3081_s1, 4096 }
   0x5   :  { %s32_s25 = sshll.u32 %s2685_s24, 4  ;;  %p2522_p0 = scmp.ne.s32.totalorder %s3081_s1, %s2521_s28  ;;  %s33_s25 = int_to_ptr.vmem [resolvable:$true] %s32_s25 }
   0x6   :  { %p2525_p1 = scmp.lt.u32.totalorder %s2521_s28, %s3081_s1 }
   0x8   :  { %p2527_p2 = pnand %p2525_p1, %p2522_p0 }
   0xa   :  { %2530 = shalt.err (!%p2527_p2)
}
   0xb   :  { %s2531_s10 = scalar_lea.vmem %s33_s25, 4096  ;;  %p2536_p4 = scmp.lt.s32.totalorder %s33_s25, %s33_s25 }
   0xc   :  { %p2532_p3 = scmp.ne.s32.totalorder %s33_s25, %s2531_s10  ;;  %p2537_p5 = scmp.lt.s32.totalorder %s2531_s10, %s2531_s10 }
   0xe   :  { %p2538_p6 = por %p2537_p5, %p2536_p4 }
  0x10   :  { %p2539_p7 = pnand %p2538_p6, %p2532_p3 }
  0x12   :  { %2542 = shalt.err (!%p2539_p7)
}
  0x13   :  { %s2686_s11 = smov 1024   ;;  %s2687_s12 = smov 64  }
  0x14   :  { %38 = dma.hbm_to_vmem [thread:$0]  %s3081_s1, 4096, %s33_s25, [#allocation6], %s2686_s11, %s2686_s11, %s2687_s12  }
  0x15   :  { %s2688_s15 = smov [#allocation8]   ;;  %s2543_s19 = scalar_lea.hbm %s3083_s3, 65536 }
  0x16   :  { %s54_s16 = sshll.u32 %s2688_s15, 4  ;;  %p2544_p8 = scmp.ne.s32.totalorder %s3083_s3, %s2543_s19  ;;  %s55_s16 = int_to_ptr.vmem [resolvable:$true] %s54_s16 }
  0x17   :  { %p2547_p9 = scmp.lt.u32.totalorder %s2543_s19, %s3083_s3 }
  0x19   :  { %p2549_p10 = pnand %p2547_p9, %p2544_p8 }
  0x1b   :  { %2552 = shalt.err (!%p2549_p10)
}
  0x1c   :  { %s2553_s24 = scalar_lea.vmem %s55_s16, 65536  ;;  %p2558_p12 = scmp.lt.s32.totalorder %s55_s16, %s55_s16 }
  0x1d   :  { %p2554_p11 = scmp.ne.s32.totalorder %s55_s16, %s2553_s24  ;;  %p2559_p13 = scmp.lt.s32.totalorder %s2553_s24, %s2553_s24 }
  0x1f   :  { %p2560_p0 = por %p2559_p13, %p2558_p12 }
  0x21   :  { %p2561_p1 = pnand %p2560_p0, %p2554_p11 }
  0x23   :  { %2564 = shalt.err (!%p2561_p1)
}
  0x24   :  { %s2689_s1 = smov 512   ;;  %s2690_s25 = smov 32  }
  0x25   :  { %60 = dma.hbm_to_vmem [thread:$0]  %s3083_s3, 65536, %s55_s16, [#allocation9], %s2689_s1, %s2689_s1, %s2690_s25  }
  0x26   :  { %s2691_s28 = smov [#allocation2]   ;;  %s2692_s30 = smov [#allocation7]  }
  0x27   :  { %s23_s29 = sshll.u32 %s2691_s28, 4  ;;  %s45_s8 = sshll.u32 %s2692_s30, 4  ;;  %s24_s29 = int_to_ptr.vmem [resolvable:$true] %s23_s29  ;;  %s46_s8 = int_to_ptr.vmem [resolvable:$true] %s45_s8 }
  0x28   :  { %s2565_s11 = scalar_lea.hbm %s3080_s0, 128 }
  0x29   :  { %p2566_p2 = scmp.ne.s32.totalorder %s3080_s0, %s2565_s11  ;;  %p2569_p3 = scmp.lt.u32.totalorder %s2565_s11, %s3080_s0 }
  0x2b   :  { %p2571_p4 = pnand %p2569_p3, %p2566_p2 }
  0x2d   :  { %2574 = shalt.err (!%p2571_p4)
}
  0x2e   :  { %s2575_s3 = scalar_lea.vmem %s24_s29, 128  ;;  %p2580_p6 = scmp.lt.s32.totalorder %s24_s29, %s24_s29 }
  0x2f   :  { %p2576_p5 = scmp.ne.s32.totalorder %s24_s29, %s2575_s3  ;;  %p2581_p7 = scmp.lt.s32.totalorder %s2575_s3, %s2575_s3 }
  0x31   :  { %p2582_p8 = por %p2581_p7, %p2580_p6 }
  0x33   :  { %p2583_p9 = pnand %p2582_p8, %p2576_p5 }
  0x35   :  { %2586 = shalt.err (!%p2583_p9)
}
  0x36   :  { %26 = dma.hbm_to_vmem [thread:$0]  %s3080_s0, 128, %s24_s29, [#allocation3]  }
  0x37   :  { %s2587_s20 = scalar_lea.hbm %s3082_s2, 128 }
  0x38   :  { %p2588_p10 = scmp.ne.s32.totalorder %s3082_s2, %s2587_s20  ;;  %p2591_p11 = scmp.lt.u32.totalorder %s2587_s20, %s3082_s2 }
  0x3a   :  { %p2593_p12 = pnand %p2591_p11, %p2588_p10 }
  0x3c   :  { %2596 = shalt.err (!%p2593_p12)
}
  0x3d   :  { %s2597_s1 = scalar_lea.vmem %s46_s8, 128  ;;  %p2602_p0 = scmp.lt.s32.totalorder %s46_s8, %s46_s8 }
  0x3e   :  { %p2598_p13 = scmp.ne.s32.totalorder %s46_s8, %s2597_s1  ;;  %p2603_p1 = scmp.lt.s32.totalorder %s2597_s1, %s2597_s1 }
  0x40   :  { %p2604_p2 = por %p2603_p1, %p2602_p0 }
  0x42   :  { %p2605_p3 = pnand %p2604_p2, %p2598_p13 }
  0x44   :  { %2608 = shalt.err (!%p2605_p3)
}
  0x45   :  { %48 = dma.hbm_to_vmem [thread:$0]  %s3082_s2, 128, %s46_s8, [#allocation6]  }
  0x46   :  { %s2693_s26 = smov [#allocation10]   ;;  %s2694_s28 = smov [#allocation11]  }
  0x47   :  { %s67_s27 = sshll.u32 %s2693_s26, 4  ;;  %s79_s29 = sshll.u32 %s2694_s28, 4  ;;  %s68_s27 = int_to_ptr.vmem [resolvable:$true] %s67_s27  ;;  %s80_s29 = int_to_ptr.vmem [resolvable:$true] %s79_s29 }
  0x48   :  { %s2609_s10 = scalar_lea.hbm %s3084_s4, 64 }
  0x49   :  { %p2610_p4 = scmp.ne.s32.totalorder %s3084_s4, %s2609_s10  ;;  %p2613_p5 = scmp.lt.u32.totalorder %s2609_s10, %s3084_s4 }
  0x4b   :  { %p2615_p6 = pnand %p2613_p5, %p2610_p4 }
  0x4d   :  { %2618 = shalt.err (!%p2615_p6)
}
  0x4e   :  { %s2619_s2 = scalar_lea.vmem %s68_s27, 64  ;;  %p2624_p8 = scmp.lt.s32.totalorder %s68_s27, %s68_s27 }
  0x4f   :  { %p2620_p7 = scmp.ne.s32.totalorder %s68_s27, %s2619_s2  ;;  %p2625_p9 = scmp.lt.s32.totalorder %s2619_s2, %s2619_s2 }
  0x51   :  { %p2626_p10 = por %p2625_p9, %p2624_p8 }
  0x53   :  { %p2627_p11 = pnand %p2626_p10, %p2620_p7 }
  0x55   :  { %2630 = shalt.err (!%p2627_p11)
}
  0x56   :  { %70 = dma.hbm_to_vmem [thread:$0]  %s3084_s4, 64, %s68_s27, [#allocation9]  }
  0x57   :  { %s2631_s17 = scalar_lea.hbm %s3086_s6, 16 }
  0x58   :  { %p2632_p12 = scmp.ne.s32.totalorder %s3086_s6, %s2631_s17  ;;  %p2635_p13 = scmp.lt.u32.totalorder %s2631_s17, %s3086_s6 }
  0x5a   :  { %p2637_p0 = pnand %p2635_p13, %p2632_p12 }
  0x5c   :  { %2640 = shalt.err (!%p2637_p0)
}
  0x5d   :  { %s2641_s22 = scalar_lea.vmem %s80_s29, 16  ;;  %s2645_s23 = scalar_lea.vmem %s80_s29, 32 }
  0x5e   :  { %p2642_p1 = scmp.ne.s32.totalorder %s80_s29, %s2641_s22  ;;  %p2646_p2 = scmp.lt.s32.totalorder %s80_s29, %s80_s29 }
  0x5f   :  { %p2647_p3 = scmp.lt.s32.totalorder %s2645_s23, %s2641_s22 }
  0x61   :  { %p2648_p4 = por %p2647_p3, %p2646_p2 }
  0x63   :  { %p2649_p5 = pnand %p2648_p4, %p2642_p1 }
  0x65   :  { %2652 = shalt.err (!%p2649_p5)
}
  0x66   :  { %82 = dma.hbm_to_vmem [thread:$0]  %s3086_s6, 16, %s80_s29, [#allocation12]  }
  0x67   :  { %2675 = dma.done.wait [#allocation3], 128  }
  0x68   :  { %2676 = vsyncadd [#allocation3], 4294967168 }
  0x69   :  { %2677 = dma.done.wait [#allocation6], 4224  }
  0x6a   :  { %2678 = vsyncadd [#allocation6], 4294963072 }
  0x6b   :  { %2679 = dma.done.wait [#allocation9], 65600  }
  0x6c   :  { %2680 = vsyncadd [#allocation9], 4294901696 }
  0x6d   :  { %2681 = dma.done.wait [#allocation12], 16  }
  0x6e   :  { %2682 = vsyncadd [#allocation12], 4294967280  ;;  %v2695_v0 = vmov 0.0   ;;  %v103_v1 = vld [vmem:[#allocation5 + $0x8] sm:$0xff]  ;;  %v102_v3 = vld [vmem:[#allocation5] sm:$0xff]  ;;  %vm176_vm0 = vcmask 261120  }
  0x6f   :  { %244 = vmatprep.mubr.f32.mxu0 %v2695_v0  ;;  %315 = vmatprep.mubr.f32.mxu1 %v2695_v0  ;;  %v111_v2 = vld [vmem:[#allocation5 + $0x48] sm:$0xff]  ;;  %v110_v5 = vld [vmem:[#allocation5 + $0x40] sm:$0xff]  ;;  %v105_v12 = vld [vmem:[#allocation5 + $0x18] sm:$0xff]  ;;  %vm1789_vm1 = vcmask 130048  }
  0x70   :  { %v1884_v4 = vpack.c.bf16 %v111_v2, %v103_v1  ;;  %v119_v6 = vld [vmem:[#allocation5 + $0x88] sm:$0xff]  ;;  %v1886_v8 = vpack.c.bf16 %v110_v5, %v102_v3  ;;  %v118_v10 = vld [vmem:[#allocation5 + $0x80] sm:$0xff]  ;;  %v113_v13 = vld [vmem:[#allocation5 + $0x58] sm:$0xff] }
  0x71   :  { %v127_v7 = vld [vmem:[#allocation5 + $0xc8] sm:$0xff]  ;;  %v126_v11 = vld [vmem:[#allocation5 + $0xc0] sm:$0xff]  ;;  %v104_v14 = vld [vmem:[#allocation5 + $0x10] sm:$0xff]  ;;  %v1892_v16 = vpack.c.bf16 %v113_v13, %v105_v12 }
  0x72   :  { %v1888_v9 = vpack.c.bf16 %v127_v7, %v119_v6  ;;  %1885 = vmatprep.subr.bf16.mxu0 %v1884_v4  ;;  %v1890_v15 = vpack.c.bf16 %v126_v11, %v118_v10  ;;  %v112_v17 = vld [vmem:[#allocation5 + $0x50] sm:$0xff]  ;;  %v121_v18 = vld [vmem:[#allocation5 + $0x98] sm:$0xff]  ;;  %v107_v24 = vld [vmem:[#allocation5 + $0x28] sm:$0xff] }
  0x73   :  { %1887 = vmatpush1.bf16.msra.mxu0 %v1886_v8  ;;  %v129_v19 = vld [vmem:[#allocation5 + $0xd8] sm:$0xff]  ;;  %v1894_v20 = vpack.c.bf16 %v112_v17, %v104_v14  ;;  %v120_v22 = vld [vmem:[#allocation5 + $0x90] sm:$0xff]  ;;  %1893 = vmatprep.subr.bf16.mxu1 %v1892_v16  ;;  %v115_v26 = vld [vmem:[#allocation5 + $0x68] sm:$0xff] }
  0x74   :  { %1889 = vmatprep.subr.bf16.mxu0 %v1888_v9  ;;  %v1896_v21 = vpack.c.bf16 %v129_v19, %v121_v18  ;;  %v128_v23 = vld [vmem:[#allocation5 + $0xd0] sm:$0xff]  ;;  %v2811_v25 = vld [vmem:[#allocation2] sm:$0xff]  ;;  %v106_v27 = vld [vmem:[#allocation5 + $0x20] sm:$0xff]  ;;  %v1900_v30 = vpack.c.bf16 %v115_v26, %v107_v24 }
  0x75   :  { %v114_v28 = vld [vmem:[#allocation5 + $0x60] sm:$0xff]  ;;  %1895 = vmatpush1.bf16.msra.mxu1 %v1894_v20  ;;  %v1898_v29 = vpack.c.bf16 %v128_v23, %v120_v22  ;;  %v123_v31 = vld [vmem:[#allocation5 + $0xa8] sm:$0xff]  ;;  %v109_v36 = vld [vmem:[#allocation5 + $0x38] sm:$0xff] }
  0x76   :  { %v131_v32 = vld [vmem:[#allocation5 + $0xe8] sm:$0xff]  ;;  %v122_v33 = vld [vmem:[#allocation5 + $0xa0] sm:$0xff]  ;;  %1897 = vmatprep.subr.bf16.mxu1 %v1896_v21  ;;  %v1902_v34 = vpack.c.bf16 %v114_v28, %v106_v27  ;;  %v117_v37 = vld [vmem:[#allocation5 + $0x78] sm:$0xff] }
  0x77   :  { %1891 = vmatpush1.bf16.msra.mxu0 %v1890_v15  ;;  %v130_v35 = vld [vmem:[#allocation5 + $0xe0] sm:$0xff]  ;;  %v1904_v38 = vpack.c.bf16 %v131_v32, %v123_v31  ;;  %v1908_v39 = vpack.c.bf16 %v117_v37, %v109_v36  ;;  %v108_v40 = vld [vmem:[#allocation5 + $0x30] sm:$0xff]  ;;  %v125_v42 = vld [vmem:[#allocation5 + $0xb8] sm:$0xff] }
  0x78   :  { %1901 = vmatprep.subr.bf16.mxu0 %v1900_v30  ;;  %v116_v41 = vld [vmem:[#allocation5 + $0x70] sm:$0xff]  ;;  %v133_v43 = vld [vmem:[#allocation5 + $0xf8] sm:$0xff]  ;;  %v1906_v47 = vpack.c.bf16 %v130_v35, %v122_v33  ;;  %v475_v51 = vld [vmem:[#allocation8 + $0x18] sm:$0xff] }
  0x79   :  { %1899 = vmatpush1.bf16.msra.mxu1 %v1898_v29  ;;  %v1910_v44 = vpack.c.bf16 %v116_v41, %v108_v40  ;;  %v473_v45 = vld [vmem:[#allocation8 + $0x8] sm:$0xff]  ;;  %v1912_v48 = vpack.c.bf16 %v133_v43, %v125_v42  ;;  %v479_v53 = vld [vmem:[#allocation8 + $0x38] sm:$0xff]  ;;  %v472_v54 = vld [vmem:[#allocation8] sm:$0xff] }
  0x7a   :  { %1809 = vmatmul.mubr.msk.f32.vlgmr.msra.gmra.mrb[0].mxu0 %vm176_vm0, %v2811_v25  ;;  %v477_v46 = vld [vmem:[#allocation8 + $0x28] sm:$0xff]  ;;  %1909 = vmatprep.subr.bf16.mxu1 %v1908_v39  ;;  %v476_v55 = vld [vmem:[#allocation8 + $0x20] sm:$0xff]  ;;  %v2172_v59 = vpack.c.bf16 %v479_v53, %v475_v51  ;;  %v474_v61 = vld [vmem:[#allocation8 + $0x10] sm:$0xff] }
  0x7b   :  { %1903 = vmatpush1.bf16.msra.mxu0 %v1902_v34  ;;  %386 = vmatprep.mubr.f32.mxu0 %v2695_v0  ;;  %v124_v49 = vld [vmem:[#allocation5 + $0xb0] sm:$0xff]  ;;  %v1916_v52 = vpack.c.bf16 %v477_v46, %v473_v45  ;;  %v1918_v60 = vpack.c.bf16 %v476_v55, %v472_v54  ;;  %v478_v62 = vld [vmem:[#allocation8 + $0x30] sm:$0xff]  ;;  %v483_v63 = vld [vmem:[#allocation8 + $0x58] sm:$0xff] }
  0x7c   :  { %v132_v50 = vld [vmem:[#allocation5 + $0xf0] sm:$0xff]  ;;  %1905 = vmatprep.subr.bf16.mxu0 %v1904_v38  ;;  %1810 = vmatmul.mubr.msk.f32.vlgmr.msra.gmra.mrb[0].mxu1 %vm176_vm0, %v2811_v25  ;;  %v487_v2 = vld [vmem:[#allocation8 + $0x78] sm:$0xff]  ;;  %v480_v3 = vld [vmem:[#allocation8 + $0x40] sm:$0xff]  ;;  %v2174_v7 = vpack.c.bf16 %v478_v62, %v474_v61 }
  0x7d   :  { %v481_v56 = vld [vmem:[#allocation8 + $0x48] sm:$0xff]  ;;  %1911 = vmatpush1.bf16.msra.mxu1 %v1910_v44  ;;  %v1914_v58 = vpack.c.bf16 %v132_v50, %v124_v49  ;;  %457 = vmatprep.mubr.f32.mxu1 %v2695_v0  ;;  %v484_v4 = vld [vmem:[#allocation8 + $0x60] sm:$0xff]  ;;  %v2176_v0 = vpack.c.bf16 %v487_v2, %v483_v63  ;;  %v482_v9 = vld [vmem:[#allocation8 + $0x50] sm:$0xff] }
  0x7e   :  { %v485_v57 = vld [vmem:[#allocation8 + $0x68] sm:$0xff]  ;;  %1913 = vmatprep.subr.bf16.mxu1 %v1912_v48  ;;  %v1922_v8 = vpack.c.bf16 %v484_v4, %v480_v3  ;;  %v486_v10 = vld [vmem:[#allocation8 + $0x70] sm:$0xff]  ;;  %v491_v11 = vld [vmem:[#allocation8 + $0x98] sm:$0xff] }
  0x7f   :  { %1907 = vmatpush1.bf16.msra.mxu0 %v1906_v47  ;;  %v1920_v1 = vpack.c.bf16 %v485_v57, %v481_v56  ;;  %v489_v5 = vld [vmem:[#allocation8 + $0x88] sm:$0xff]  ;;  %v495_v13 = vld [vmem:[#allocation8 + $0xb8] sm:$0xff]  ;;  %v488_v14 = vld [vmem:[#allocation8 + $0x80] sm:$0xff]  ;;  %v2178_v18 = vpack.c.bf16 %v486_v10, %v482_v9 }
  0x80   :  { %1917 = vmatprep.subr.bf16.mxu0 %v1916_v52  ;;  %v493_v6 = vld [vmem:[#allocation8 + $0xa8] sm:$0xff]  ;;  %v492_v15 = vld [vmem:[#allocation8 + $0xa0] sm:$0xff]  ;;  %v2180_v19 = vpack.c.bf16 %v495_v13, %v491_v11  ;;  %v490_v21 = vld [vmem:[#allocation8 + $0x90] sm:$0xff] }
  0x81   :  { %1915 = vmatpush1.bf16.msra.mxu1 %v1914_v58  ;;  %v1924_v12 = vpack.c.bf16 %v493_v6, %v489_v5  ;;  %v497_v16 = vld [vmem:[#allocation8 + $0xc8] sm:$0xff]  ;;  %v1926_v20 = vpack.c.bf16 %v492_v15, %v488_v14  ;;  %v494_v22 = vld [vmem:[#allocation8 + $0xb0] sm:$0xff]  ;;  %v499_v23 = vld [vmem:[#allocation8 + $0xd8] sm:$0xff] }
  0x82   :  { %1811 = vmatmul.mubr.msk.f32.vlgmr.msra.gmra.mrb[2].mxu0 %vm176_vm0, %v2811_v25  ;;  %2173 = vmatprep.subr.bf16.mxu1 %v2172_v59  ;;  %v501_v17 = vld [vmem:[#allocation8 + $0xe8] sm:$0xff]  ;;  %v503_v26 = vld [vmem:[#allocation8 + $0xf8] sm:$0xff]  ;;  %v496_v27 = vld [vmem:[#allocation8 + $0xc0] sm:$0xff] }
  0x83   :  { %1919 = vmatpush1.bf16.msra.mxu0 %v1918_v60  ;;  %v1928_v24 = vpack.c.bf16 %v501_v17, %v497_v16  ;;  %v500_v28 = vld [vmem:[#allocation8 + $0xe0] sm:$0xff]  ;;  %v505_v29 = vld [vmem:[#allocation8 + $0x108] sm:$0xff]  ;;  %v2184_v31 = vpack.c.bf16 %v503_v26, %v499_v23  ;;  %v498_v33 = vld [vmem:[#allocation8 + $0xd0] sm:$0xff] }
  0x84   :  { %1921 = vmatprep.subr.bf16.mxu0 %v1920_v1  ;;  %1812 = vmatmul.mubr.msk.f32.vlgmr.msra.gmra.mrb[2].mxu1 %vm176_vm0, %v2811_v25  ;;  %v509_v30 = vld [vmem:[#allocation8 + $0x128] sm:$0xff]  ;;  %v2182_v25 = vpack.c.bf16 %v494_v22, %v490_v21  ;;  %v1930_v32 = vpack.c.bf16 %v500_v28, %v496_v27  ;;  %v502_v34 = vld [vmem:[#allocation8 + $0xf0] sm:$0xff]  ;;  %v507_v35 = vld [vmem:[#allocation8 + $0x118] sm:$0xff] }
  0x85   :  { %2175 = vmatpush1.bf16.msra.mxu1 %v2174_v7  ;;  %v1932_v36 = vpack.c.bf16 %v509_v30, %v505_v29  ;;  %v511_v37 = vld [vmem:[#allocation8 + $0x138] sm:$0xff]  ;;  %v504_v38 = vld [vmem:[#allocation8 + $0x100] sm:$0xff]  ;;  %v513_v40 = vld [vmem:[#allocation8 + $0x148] sm:$0xff]  ;;  %v2186_v42 = vpack.c.bf16 %v502_v34, %v498_v33 }
  0x86   :  { %2177 = vmatprep.subr.bf16.mxu1 %v2176_v0  ;;  %v508_v39 = vld [vmem:[#allocation8 + $0x120] sm:$0xff]  ;;  %v517_v41 = vld [vmem:[#allocation8 + $0x168] sm:$0xff]  ;;  %v2188_v43 = vpack.c.bf16 %v511_v37, %v507_v35  ;;  %v506_v45 = vld [vmem:[#allocation8 + $0x110] sm:$0xff] }
  0x87   :  { %1923 = vmatpush1.bf16.msra.mxu0 %v1922_v8  ;;  %v1934_v44 = vpack.c.bf16 %v508_v39, %v504_v38  ;;  %v510_v46 = vld [vmem:[#allocation8 + $0x130] sm:$0xff]  ;;  %v515_v47 = vld [vmem:[#allocation8 + $0x158] sm:$0xff]  ;;  %v1936_v48 = vpack.c.bf16 %v517_v41, %v513_v40  ;;  %v512_v50 = vld [vmem:[#allocation8 + $0x140] sm:$0xff] }
  0x88   :  { %1925 = vmatprep.subr.bf16.mxu0 %v1924_v12  ;;  %v519_v49 = vld [vmem:[#allocation8 + $0x178] sm:$0xff]  ;;  %v516_v51 = vld [vmem:[#allocation8 + $0x160] sm:$0xff]  ;;  %v521_v52 = vld [vmem:[#allocation8 + $0x188] sm:$0xff]  ;;  %v2190_v54 = vpack.c.bf16 %v510_v46, %v506_v45 }
  0x89   :  { %2179 = vmatpush1.bf16.msra.mxu1 %v2178_v18  ;;  %v525_v53 = vld [vmem:[#allocation8 + $0x1a8] sm:$0xff]  ;;  %v2192_v55 = vpack.c.bf16 %v519_v49, %v515_v47  ;;  %v1938_v56 = vpack.c.bf16 %v516_v51, %v512_v50  ;;  %v514_v57 = vld [vmem:[#allocation8 + $0x150] sm:$0xff]  ;;  %v523_v59 = vld [vmem:[#allocation8 + $0x198] sm:$0xff] }
  0x8a   :  { %2181 = vmatprep.subr.bf16.mxu1 %v2180_v19  ;;  %v518_v58 = vld [vmem:[#allocation8 + $0x170] sm:$0xff]  ;;  %v1940_v60 = vpack.c.bf16 %v525_v53, %v521_v52  ;;  %v527_v61 = vld [vmem:[#allocation8 + $0x1b8] sm:$0xff]  ;;  %v520_v62 = vld [vmem:[#allocation8 + $0x180] sm:$0xff] }
  0x8b   :  { %1927 = vmatpush1.bf16.msra.mxu0 %v1926_v20  ;;  %v524_v63 = vld [vmem:[#allocation8 + $0x1a0] sm:$0xff]  ;;  %v529_v1 = vld [vmem:[#allocation8 + $0x1c8] sm:$0xff]  ;;  %v2194_v3 = vpack.c.bf16 %v518_v58, %v514_v57  ;;  %v2196_v4 = vpack.c.bf16 %v527_v61, %v523_v59  ;;  %v522_v6 = vld [vmem:[#allocation8 + $0x190] sm:$0xff] }
  0x8c   :  { %1929 = vmatprep.subr.bf16.mxu0 %v1928_v24  ;;  %v533_v2 = vld [vmem:[#allocation8 + $0x1e8] sm:$0xff]  ;;  %v1942_v5 = vpack.c.bf16 %v524_v63, %v520_v62  ;;  %v526_v7 = vld [vmem:[#allocation8 + $0x1b0] sm:$0xff]  ;;  %v531_v0 = vld [vmem:[#allocation8 + $0x1d8] sm:$0xff] }
  0x8d   :  { %2183 = vmatpush1.bf16.msra.mxu1 %v2182_v25  ;;  %v1944_v8 = vpack.c.bf16 %v533_v2, %v529_v1  ;;  %v535_v9 = vld [vmem:[#allocation8 + $0x1f8] sm:$0xff]  ;;  %v528_v10 = vld [vmem:[#allocation8 + $0x1c0] sm:$0xff]  ;;  %v537_v12 = vld [vmem:[#allocation8 + $0x208] sm:$0xff]  ;;  %v2198_v14 = vpack.c.bf16 %v526_v7, %v522_v6 }
  0x8e   :  { %2185 = vmatprep.subr.bf16.mxu1 %v2184_v31  ;;  %v532_v11 = vld [vmem:[#allocation8 + $0x1e0] sm:$0xff]  ;;  %v541_v13 = vld [vmem:[#allocation8 + $0x228] sm:$0xff]  ;;  %v2200_v15 = vpack.c.bf16 %v535_v9, %v531_v0  ;;  %v530_v17 = vld [vmem:[#allocation8 + $0x1d0] sm:$0xff] }
  0x8f   :  { %1931 = vmatpush1.bf16.msra.mxu0 %v1930_v32  ;;  %v1946_v16 = vpack.c.bf16 %v532_v11, %v528_v10  ;;  %v534_v18 = vld [vmem:[#allocation8 + $0x1f0] sm:$0xff]  ;;  %v539_v19 = vld [vmem:[#allocation8 + $0x218] sm:$0xff]  ;;  %v1948_v20 = vpack.c.bf16 %v541_v13, %v537_v12  ;;  %v536_v22 = vld [vmem:[#allocation8 + $0x200] sm:$0xff] }
  0x90   :  { %1933 = vmatprep.subr.bf16.mxu0 %v1932_v36  ;;  %v543_v21 = vld [vmem:[#allocation8 + $0x238] sm:$0xff]  ;;  %v540_v23 = vld [vmem:[#allocation8 + $0x220] sm:$0xff]  ;;  %v545_v24 = vld [vmem:[#allocation8 + $0x248] sm:$0xff]  ;;  %v2202_v27 = vpack.c.bf16 %v534_v18, %v530_v17 }
  0x91   :  { %2187 = vmatpush1.bf16.msra.mxu1 %v2186_v42  ;;  %v549_v26 = vld [vmem:[#allocation8 + $0x268] sm:$0xff]  ;;  %v2204_v28 = vpack.c.bf16 %v543_v21, %v539_v19  ;;  %v1950_v29 = vpack.c.bf16 %v540_v23, %v536_v22  ;;  %v538_v30 = vld [vmem:[#allocation8 + $0x210] sm:$0xff]  ;;  %v547_v31 = vld [vmem:[#allocation8 + $0x258] sm:$0xff] }
  0x92   :  { %2189 = vmatprep.subr.bf16.mxu1 %v2188_v43  ;;  %v542_v25 = vld [vmem:[#allocation8 + $0x230] sm:$0xff]  ;;  %v1952_v32 = vpack.c.bf16 %v549_v26, %v545_v24  ;;  %v551_v33 = vld [vmem:[#allocation8 + $0x278] sm:$0xff]  ;;  %v544_v34 = vld [vmem:[#allocation8 + $0x240] sm:$0xff] }
  0x93   :  { %1935 = vmatpush1.bf16.msra.mxu0 %v1934_v44  ;;  %v548_v35 = vld [vmem:[#allocation8 + $0x260] sm:$0xff]  ;;  %v553_v36 = vld [vmem:[#allocation8 + $0x288] sm:$0xff]  ;;  %v2206_v38 = vpack.c.bf16 %v542_v25, %v538_v30  ;;  %v2208_v39 = vpack.c.bf16 %v551_v33, %v547_v31  ;;  %v546_v41 = vld [vmem:[#allocation8 + $0x250] sm:$0xff] }
  0x94   :  { %1937 = vmatprep.subr.bf16.mxu0 %v1936_v48  ;;  %v557_v37 = vld [vmem:[#allocation8 + $0x2a8] sm:$0xff]  ;;  %v1954_v40 = vpack.c.bf16 %v548_v35, %v544_v34  ;;  %v550_v42 = vld [vmem:[#allocation8 + $0x270] sm:$0xff]  ;;  %v555_v43 = vld [vmem:[#allocation8 + $0x298] sm:$0xff] }
  0x95   :  { %2191 = vmatpush1.bf16.msra.mxu1 %v2190_v54  ;;  %v1956_v44 = vpack.c.bf16 %v557_v37, %v553_v36  ;;  %v559_v45 = vld [vmem:[#allocation8 + $0x2b8] sm:$0xff]  ;;  %v552_v46 = vld [vmem:[#allocation8 + $0x280] sm:$0xff]  ;;  %v561_v48 = vld [vmem:[#allocation8 + $0x2c8] sm:$0xff]  ;;  %v2210_v50 = vpack.c.bf16 %v550_v42, %v546_v41 }
  0x96   :  { %2193 = vmatprep.subr.bf16.mxu1 %v2192_v55  ;;  %v556_v47 = vld [vmem:[#allocation8 + $0x2a0] sm:$0xff]  ;;  %v565_v49 = vld [vmem:[#allocation8 + $0x2e8] sm:$0xff]  ;;  %v2212_v51 = vpack.c.bf16 %v559_v45, %v555_v43  ;;  %v554_v53 = vld [vmem:[#allocation8 + $0x290] sm:$0xff] }
  0x97   :  { %1939 = vmatpush1.bf16.msra.mxu0 %v1938_v56  ;;  %v1958_v52 = vpack.c.bf16 %v556_v47, %v552_v46  ;;  %v558_v54 = vld [vmem:[#allocation8 + $0x2b0] sm:$0xff]  ;;  %v563_v55 = vld [vmem:[#allocation8 + $0x2d8] sm:$0xff]  ;;  %v1960_v56 = vpack.c.bf16 %v565_v49, %v561_v48  ;;  %v560_v58 = vld [vmem:[#allocation8 + $0x2c0] sm:$0xff] }
  0x98   :  { %1941 = vmatprep.subr.bf16.mxu0 %v1940_v60  ;;  %v567_v57 = vld [vmem:[#allocation8 + $0x2f8] sm:$0xff]  ;;  %v564_v59 = vld [vmem:[#allocation8 + $0x2e0] sm:$0xff]  ;;  %v569_v60 = vld [vmem:[#allocation8 + $0x308] sm:$0xff]  ;;  %v2214_v62 = vpack.c.bf16 %v558_v54, %v554_v53 }
  0x99   :  { %2195 = vmatpush1.bf16.msra.mxu1 %v2194_v3  ;;  %v573_v61 = vld [vmem:[#allocation8 + $0x328] sm:$0xff]  ;;  %v2216_v63 = vpack.c.bf16 %v567_v57, %v563_v55  ;;  %v1962_v1 = vpack.c.bf16 %v564_v59, %v560_v58  ;;  %v562_v2 = vld [vmem:[#allocation8 + $0x2d0] sm:$0xff]  ;;  %v575_v6 = vld [vmem:[#allocation8 + $0x338] sm:$0xff] }
  0x9a   :  { %2197 = vmatprep.subr.bf16.mxu1 %v2196_v4  ;;  %v566_v3 = vld [vmem:[#allocation8 + $0x2f0] sm:$0xff]  ;;  %v571_v4 = vld [vmem:[#allocation8 + $0x318] sm:$0xff]  ;;  %v568_v7 = vld [vmem:[#allocation8 + $0x300] sm:$0xff] }
  0x9b   :  { %1943 = vmatpush1.bf16.msra.mxu0 %v1942_v5  ;;  %v1964_v5 = vpack.c.bf16 %v573_v61, %v569_v60  ;;  %v572_v0 = vld [vmem:[#allocation8 + $0x320] sm:$0xff]  ;;  %v581_v9 = vld [vmem:[#allocation8 + $0x368] sm:$0xff]  ;;  %v2218_v10 = vpack.c.bf16 %v566_v3, %v562_v2  ;;  %v2220_v11 = vpack.c.bf16 %v575_v6, %v571_v4  ;;  %v570_v13 = vld [vmem:[#allocation8 + $0x310] sm:$0xff] }
  0x9c   :  { %1945 = vmatprep.subr.bf16.mxu0 %v1944_v8  ;;  %v577_v8 = vld [vmem:[#allocation8 + $0x348] sm:$0xff]  ;;  %v1966_v12 = vpack.c.bf16 %v572_v0, %v568_v7  ;;  %v583_v17 = vld [vmem:[#allocation8 + $0x378] sm:$0xff]  ;;  %v576_v18 = vld [vmem:[#allocation8 + $0x340] sm:$0xff] }
  0x9d   :  { %2199 = vmatpush1.bf16.msra.mxu1 %v2198_v14  ;;  %v574_v14 = vld [vmem:[#allocation8 + $0x330] sm:$0xff]  ;;  %v580_v19 = vld [vmem:[#allocation8 + $0x360] sm:$0xff]  ;;  %v589_v21 = vld [vmem:[#allocation8 + $0x3a8] sm:$0xff] }
  0x9e   :  { %2201 = vmatprep.subr.bf16.mxu1 %v2200_v15  ;;  %v579_v15 = vld [vmem:[#allocation8 + $0x358] sm:$0xff]  ;;  %v2222_v22 = vpack.c.bf16 %v574_v14, %v570_v13  ;;  %v1970_v24 = vpack.c.bf16 %v580_v19, %v576_v18  ;;  %v578_v26 = vld [vmem:[#allocation8 + $0x350] sm:$0xff]  ;;  %v584_v25 = vld [vmem:[#allocation8 + $0x380] sm:$0xff] }
  0x9f   :  { %1947 = vmatpush1.bf16.msra.mxu0 %v1946_v16  ;;  %v1968_v16 = vpack.c.bf16 %v581_v9, %v577_v8  ;;  %v2224_v23 = vpack.c.bf16 %v583_v17, %v579_v15  ;;  %v591_v30 = vld [vmem:[#allocation8 + $0x3b8] sm:$0xff]  ;;  %v588_v31 = vld [vmem:[#allocation8 + $0x3a0] sm:$0xff]  ;;  %v586_v35 = vld [vmem:[#allocation8 + $0x390] sm:$0xff] }
  0xa0   :  { %1949 = vmatprep.subr.bf16.mxu0 %v1948_v20  ;;  %v585_v20 = vld [vmem:[#allocation8 + $0x388] sm:$0xff]  ;;  %v1974_v34 = vpack.c.bf16 %v588_v31, %v584_v25  ;;  %v590_v36 = vld [vmem:[#allocation8 + $0x3b0] sm:$0xff]  ;;  %v599_v42 = vld [vmem:[#allocation8 + $0x3f8] sm:$0xff] }
  0xa1   :  { %2203 = vmatpush1.bf16.msra.mxu1 %v2202_v27  ;;  %v582_v27 = vld [vmem:[#allocation8 + $0x370] sm:$0xff]  ;;  %v2230_v37 = vpack.c.bf16 %v590_v36, %v586_v35  ;;  %v592_v43 = vld [vmem:[#allocation8 + $0x3c0] sm:$0xff]  ;;  %v607_v54 = vld [vmem:[#allocation8 + $0x438] sm:$0xff] }
  0xa2   :  { %2205 = vmatprep.subr.bf16.mxu1 %v2204_v28  ;;  %v587_v28 = vld [vmem:[#allocation8 + $0x398] sm:$0xff]  ;;  %v594_v47 = vld [vmem:[#allocation8 + $0x3d0] sm:$0xff]  ;;  %v600_v2 = vld [vmem:[#allocation8 + $0x400] sm:$0xff] }
  0xa3   :  { %1951 = vmatpush1.bf16.msra.mxu0 %v1950_v29  ;;  %v1972_v29 = vpack.c.bf16 %v589_v21, %v585_v20  ;;  %v2228_v33 = vpack.c.bf16 %v591_v30, %v587_v28  ;;  %v598_v48 = vld [vmem:[#allocation8 + $0x3f0] sm:$0xff]  ;;  %v2826_v59 = vld [vmem:[#allocation7] sm:$0xff]  ;;  %v604_v3 = vld [vmem:[#allocation8 + $0x420] sm:$0xff] }
  0xa4   :  { %1953 = vmatprep.subr.bf16.mxu0 %v1952_v32  ;;  %v2226_v32 = vpack.c.bf16 %v582_v27, %v578_v26  ;;  %v2234_v49 = vpack.c.bf16 %v598_v48, %v594_v47  ;;  %v602_v6 = vld [vmem:[#allocation8 + $0x410] sm:$0xff]  ;;  %v609_v0 = vld [vmem:[#allocation8 + $0x448] sm:$0xff]  ;;  %v1982_v15 = vpack.c.bf16 %v604_v3, %v600_v2  ;;  %v608_v17 = vld [vmem:[#allocation8 + $0x440] sm:$0xff] }
  0xa5   :  { %2207 = vmatpush1.bf16.msra.mxu1 %v2206_v38  ;;  %v593_v38 = vld [vmem:[#allocation8 + $0x3c8] sm:$0xff]  ;;  %v606_v7 = vld [vmem:[#allocation8 + $0x430] sm:$0xff]  ;;  %v612_v18 = vld [vmem:[#allocation8 + $0x460] sm:$0xff] }
  0xa6   :  { %2209 = vmatprep.subr.bf16.mxu1 %v2208_v39  ;;  %v597_v39 = vld [vmem:[#allocation8 + $0x3e8] sm:$0xff]  ;;  %v623_v30 = vld [vmem:[#allocation8 + $0x4b8] sm:$0xff]  ;;  %v1986_v31 = vpack.c.bf16 %v612_v18, %v608_v17  ;;  %v624_v47 = vld [vmem:[#allocation8 + $0x4c0] sm:$0xff] }
  0xa7   :  { %1955 = vmatpush1.bf16.msra.mxu0 %v1954_v40  ;;  %v595_v40 = vld [vmem:[#allocation8 + $0x3d8] sm:$0xff]  ;;  %v1976_v41 = vpack.c.bf16 %v597_v39, %v593_v38  ;;  %v617_v26 = vld [vmem:[#allocation8 + $0x488] sm:$0xff]  ;;  %v618_v38 = vld [vmem:[#allocation8 + $0x490] sm:$0xff] }
  0xa8   :  { %1957 = vmatprep.subr.bf16.mxu0 %v1956_v44  ;;  %v596_v44 = vld [vmem:[#allocation8 + $0x3e0] sm:$0xff]  ;;  %v2232_v45 = vpack.c.bf16 %v599_v42, %v595_v40  ;;  %v621_v28 = vld [vmem:[#allocation8 + $0x4a8] sm:$0xff]  ;;  %v622_v39 = vld [vmem:[#allocation8 + $0x4b0] sm:$0xff] }
  0xa9   :  { %2211 = vmatpush1.bf16.msra.mxu1 %v2210_v50  ;;  %v1978_v46 = vpack.c.bf16 %v596_v44, %v592_v43  ;;  %v601_v50 = vld [vmem:[#allocation8 + $0x408] sm:$0xff]  ;;  %v1988_v36 = vpack.c.bf16 %v621_v28, %v617_v26  ;;  %v627_v43 = vld [vmem:[#allocation8 + $0x4d8] sm:$0xff]  ;;  %v628_v48 = vld [vmem:[#allocation8 + $0x4e0] sm:$0xff] }
  0xaa   :  { %2213 = vmatprep.subr.bf16.mxu1 %v2212_v51  ;;  %v605_v51 = vld [vmem:[#allocation8 + $0x428] sm:$0xff]  ;;  %v631_v44 = vld [vmem:[#allocation8 + $0x4f8] sm:$0xff]  ;;  %v636_v2 = vld [vmem:[#allocation8 + $0x520] sm:$0xff] }
  0xab   :  { %1959 = vmatpush1.bf16.msra.mxu0 %v1958_v52  ;;  %v603_v52 = vld [vmem:[#allocation8 + $0x418] sm:$0xff]  ;;  %v1980_v53 = vpack.c.bf16 %v605_v51, %v601_v50  ;;  %v625_v40 = vld [vmem:[#allocation8 + $0x4c8] sm:$0xff]  ;;  %v2248_v50 = vpack.c.bf16 %v631_v44, %v627_v43  ;;  %v626_v51 = vld [vmem:[#allocation8 + $0x4d0] sm:$0xff] }
  0xac   :  { %1961 = vmatprep.subr.bf16.mxu0 %v1960_v56  ;;  %v2236_v55 = vpack.c.bf16 %v607_v54, %v603_v52  ;;  %v136_v56 = vlaneseq  ;;  %v629_v42 = vld [vmem:[#allocation8 + $0x4e8] sm:$0xff]  ;;  %v630_v52 = vld [vmem:[#allocation8 + $0x4f0] sm:$0xff]  ;;  %v648_v26 = vld [vmem:[#allocation8 + $0x580] sm:$0xff] }
  0xad   :  { %2215 = vmatpush1.bf16.msra.mxu1 %v2214_v62  ;;  %v637_v54 = vld [vmem:[#allocation8 + $0x528] sm:$0xff]  ;;  %v642_v17 = vld [vmem:[#allocation8 + $0x550] sm:$0xff] }
  0xae   :  { %2217 = vmatprep.subr.bf16.mxu1 %v2216_v63  ;;  %v2823_v57 = vshrl.u32 %v136_v56, 7  ;;  %v639_v56 = vld [vmem:[#allocation8 + $0x538] sm:$0xff]  ;;  %v646_v18 = vld [vmem:[#allocation8 + $0x570] sm:$0xff] }
  0xaf   :  { %1963 = vmatpush1.bf16.msra.mxu0 %v1962_v1 }
  0xb0   :  { %1965 = vmatprep.subr.bf16.mxu0 %v1964_v5  ;;  %v138_v58 = vsub.s32 0, %v2823_v57  ;;  %v142_v60 = vsub.s32 1, %v2823_v57  ;;  %v150_v62 = vsub.s32 3, %v2823_v57 }
  0xb1   :  { %2219 = vmatpush1.bf16.msra.mxu1 %v2218_v10  ;;  %v613_v10 = vld [vmem:[#allocation8 + $0x468] sm:$0xff] }
  0xb2   :  { %2221 = vmatprep.subr.bf16.mxu1 %v2220_v11  ;;  %v139_v61 = vrot.slane %v2826_v59, %v138_v58  ;;  %v143_v63 = vrot.slane %v2826_v59, %v142_v60  ;;  %v151_v8 = vrot.slane %v2826_v59, %v150_v62  ;;  %v611_v11 = vld [vmem:[#allocation8 + $0x458] sm:$0xff]  ;;  %v1984_v21 = vpack.c.bf16 %v613_v10, %v609_v0  ;;  %v645_v0 = vld [vmem:[#allocation8 + $0x568] sm:$0xff] }
  0xb3   :  { %1967 = vmatpush1.bf16.msra.mxu0 %v1966_v12  ;;  %v615_v12 = vld [vmem:[#allocation8 + $0x478] sm:$0xff] }
  0xb4   :  { %1969 = vmatprep.subr.bf16.mxu0 %v1968_v16  ;;  %v2238_v16 = vpack.c.bf16 %v606_v7, %v602_v6  ;;  %v638_v6 = vld [vmem:[#allocation8 + $0x530] sm:$0xff]  ;;  %v641_v7 = vld [vmem:[#allocation8 + $0x548] sm:$0xff] }
  0xb5   :  { %2223 = vmatpush1.bf16.msra.mxu1 %v2222_v22  ;;  %v2240_v22 = vpack.c.bf16 %v615_v12, %v611_v11  ;;  %v640_v12 = vld [vmem:[#allocation8 + $0x540] sm:$0xff] }
  0xb6   :  { %2225 = vmatprep.subr.bf16.mxu1 %v2224_v23  ;;  %v610_v23 = vld [vmem:[#allocation8 + $0x450] sm:$0xff] }
  0xb7   :  { %1971 = vmatpush1.bf16.msra.mxu0 %v1970_v24  ;;  %v614_v24 = vld [vmem:[#allocation8 + $0x470] sm:$0xff] }
  0xb8   :  { %1973 = vmatprep.subr.bf16.mxu0 %v1972_v29  ;;  %v619_v29 = vld [vmem:[#allocation8 + $0x498] sm:$0xff] }
  0xb9   :  { %2227 = vmatpush1.bf16.msra.mxu1 %v2226_v32  ;;  %v2242_v32 = vpack.c.bf16 %v614_v24, %v610_v23  ;;  %v2258_v24 = vpack.c.bf16 %v646_v18, %v642_v17 }
  0xba   :  { %2229 = vmatprep.subr.bf16.mxu1 %v2228_v33  ;;  %v616_v33 = vld [vmem:[#allocation8 + $0x480] sm:$0xff] }
  0xbb   :  { %1975 = vmatpush1.bf16.msra.mxu0 %v1974_v34  ;;  %v620_v34 = vld [vmem:[#allocation8 + $0x4a0] sm:$0xff] }
  0xbc   :  { %1977 = vmatprep.subr.bf16.mxu0 %v1976_v41 }
  0xbd   :  { %2231 = vmatpush1.bf16.msra.mxu1 %v2230_v37  ;;  %v2244_v37 = vpack.c.bf16 %v623_v30, %v619_v29  ;;  %v650_v30 = vld [vmem:[#allocation8 + $0x590] sm:$0xff] }
  0xbe   :  { %2233 = vmatprep.subr.bf16.mxu1 %v2232_v45  ;;  %v1990_v45 = vpack.c.bf16 %v620_v34, %v616_v33  ;;  %v661_v33 = vld [vmem:[#allocation8 + $0x5e8] sm:$0xff]  ;;  %v659_v34 = vld [vmem:[#allocation8 + $0x5d8] sm:$0xff] }
  0xbf   :  { %1979 = vmatpush1.bf16.msra.mxu0 %v1978_v46  ;;  %v2246_v46 = vpack.c.bf16 %v622_v39, %v618_v38  ;;  %v656_v39 = vld [vmem:[#allocation8 + $0x5c0] sm:$0xff] }
  0xc0   :  { %1981 = vmatprep.subr.bf16.mxu0 %v1980_v53  ;;  %v633_v53 = vld [vmem:[#allocation8 + $0x508] sm:$0xff] }
  0xc1   :  { %2235 = vmatpush1.bf16.msra.mxu1 %v2234_v49  ;;  %v1992_v49 = vpack.c.bf16 %v629_v42, %v625_v40  ;;  %v1996_v3 = vpack.c.bf16 %v637_v54, %v633_v53  ;;  %v660_v40 = vld [vmem:[#allocation8 + $0x5e0] sm:$0xff] }
  0xc2   :  { %2237 = vmatprep.subr.bf16.mxu1 %v2236_v55  ;;  %v635_v55 = vld [vmem:[#allocation8 + $0x518] sm:$0xff]  ;;  %v664_v53 = vld [vmem:[#allocation8 + $0x600] sm:$0xff] }
  0xc3   :  { %v668_v54 = vld [vmem:[#allocation8 + $0x620] sm:$0xff] }
 0x14d   :  { %v246_v1 = vpop.f32.mrb[0].mxu0 }
 0x14e   :  { %v247_v4 = vadd.f32 %v246_v1, %v139_v61  ;;  %v248_v5 = vpop.f32.mrb[1].mxu0  ;;  %v1994_v61 = vpack.c.bf16 %v628_v48, %v624_v47  ;;  %v632_v1 = vld [vmem:[#allocation8 + $0x500] sm:$0xff]  ;;  %v665_v47 = vld [vmem:[#allocation8 + $0x608] sm:$0xff] }
 0x14f   :  { %v249_v9 = vadd.f32 %v248_v5, %v143_v63  ;;  %v2839_v13 = vpop.f32.mrb[0].mxu1  ;;  %v2250_v63 = vpack.c.bf16 %v630_v52, %v626_v51  ;;  %v634_v5 = vld [vmem:[#allocation8 + $0x510] sm:$0xff]  ;;  %v1998_v10 = vpack.c.bf16 %v636_v2, %v632_v1  ;;  %v669_v48 = vld [vmem:[#allocation8 + $0x628] sm:$0xff]  ;;  %v2010_v51 = vpack.c.bf16 %v660_v40, %v656_v39 }
 0x150   :  { %v319_v19 = vpop.f32.mrb[1].mxu1  ;;  %v464_v20 = vmax.f32 %v247_v4, 0.0  ;;  %v2252_v4 = vpack.c.bf16 %v639_v56, %v635_v55  ;;  %v2254_v11 = vpack.c.bf16 %v638_v6, %v634_v5  ;;  %v2012_v55 = vpack.c.bf16 %v669_v48, %v665_v47  ;;  %v673_v1 = vld [vmem:[#allocation8 + $0x648] sm:$0xff]  ;;  %v696_v47 = vld [vmem:[#allocation8 + $0x700] sm:$0xff] }
 0x151   :  { %v465_v14 = vmax.f32 %v249_v9, 0.0  ;;  %v320_v27 = vadd.f32 %v319_v19, %v151_v8  ;;  %v643_v8 = vld [vmem:[#allocation8 + $0x558] sm:$0xff]  ;;  %v649_v19 = vld [vmem:[#allocation8 + $0x588] sm:$0xff]  ;;  %v2014_v5 = vpack.c.bf16 %v668_v54, %v664_v53  ;;  %v700_v48 = vld [vmem:[#allocation8 + $0x720] sm:$0xff] }
 0x152   :  { %v647_v9 = vld [vmem:[#allocation8 + $0x578] sm:$0xff]  ;;  %v677_v2 = vld [vmem:[#allocation8 + $0x668] sm:$0xff] }
 0x153   :  { %1070 = vmatprep.mubr.f32.mxu0 %v465_v14  ;;  %1354 = vmatprep.mubr.f32.mxu1 %v465_v14  ;;  %v467_v25 = vmax.f32 %v320_v27, 0.0  ;;  %v644_v14 = vld [vmem:[#allocation8 + $0x560] sm:$0xff]  ;;  %v697_v39 = vld [vmem:[#allocation8 + $0x708] sm:$0xff] }
 0x154   :  { %1071 = vmatmul.mubr.f32.vlgmr.msra.gmra.mrb[4].mxu0 %v464_v20  ;;  %1355 = vmatmul.mubr.f32.vlgmr.msra.gmra.mrb[4].mxu1 %v464_v20  ;;  %v653_v20 = vld [vmem:[#allocation8 + $0x5a8] sm:$0xff]  ;;  %v2002_v23 = vpack.c.bf16 %v644_v14, %v640_v12  ;;  %v652_v27 = vld [vmem:[#allocation8 + $0x5a0] sm:$0xff] }
 0x155   :  { %1983 = vmatpush1.bf16.msra.mxu0 %v1982_v15  ;;  %2239 = vmatpush1.bf16.msra.mxu1 %v2238_v16  ;;  %v2841_v35 = vpop.f32.mrb[2].mxu0  ;;  %v2000_v15 = vpack.c.bf16 %v645_v0, %v641_v7  ;;  %v2256_v16 = vpack.c.bf16 %v647_v9, %v643_v8  ;;  %v2004_v28 = vpack.c.bf16 %v653_v20, %v649_v19  ;;  %v672_v7 = vld [vmem:[#allocation8 + $0x640] sm:$0xff]  ;;  %v681_v12 = vld [vmem:[#allocation8 + $0x688] sm:$0xff] }
 0x156   :  { %1985 = vmatprep.subr.bf16.mxu0 %v1984_v21  ;;  %2241 = vmatprep.subr.bf16.mxu1 %v2240_v22  ;;  %v2843_v41 = vpop.f32.mrb[3].mxu0  ;;  %v651_v21 = vld [vmem:[#allocation8 + $0x598] sm:$0xff]  ;;  %v676_v0 = vld [vmem:[#allocation8 + $0x660] sm:$0xff]  ;;  %v2016_v8 = vpack.c.bf16 %v677_v2, %v673_v1  ;;  %v685_v14 = vld [vmem:[#allocation8 + $0x6a8] sm:$0xff] }
 0x157   :  { %1141 = vmatprep.mubr.f32.mxu0 %v467_v25  ;;  %1425 = vmatprep.mubr.f32.mxu1 %v467_v25  ;;  %v655_v22 = vld [vmem:[#allocation8 + $0x5b8] sm:$0xff]  ;;  %v654_v25 = vld [vmem:[#allocation8 + $0x5b0] sm:$0xff]  ;;  %v2018_v17 = vpack.c.bf16 %v676_v0, %v672_v7  ;;  %v680_v19 = vld [vmem:[#allocation8 + $0x680] sm:$0xff] }
 0x158   :  { %v2260_v29 = vpack.c.bf16 %v655_v22, %v651_v21  ;;  %v2262_v38 = vpack.c.bf16 %v654_v25, %v650_v30  ;;  %v684_v20 = vld [vmem:[#allocation8 + $0x6a0] sm:$0xff]  ;;  %v2020_v21 = vpack.c.bf16 %v685_v14, %v681_v12  ;;  %v701_v40 = vld [vmem:[#allocation8 + $0x728] sm:$0xff] }
 0x159   :  { %1987 = vmatpush1.bf16.msra.mxu0 %v1986_v31  ;;  %2243 = vmatpush1.bf16.msra.mxu1 %v2242_v32  ;;  %v657_v31 = vld [vmem:[#allocation8 + $0x5c8] sm:$0xff]  ;;  %v2845_v32 = vpop.f32.mrb[2].mxu1  ;;  %v2022_v30 = vpack.c.bf16 %v684_v20, %v680_v19  ;;  %v704_v1 = vld [vmem:[#allocation8 + $0x740] sm:$0xff]  ;;  %v718_v19 = vld [vmem:[#allocation8 + $0x7b0] sm:$0xff] }
 0x15a   :  { %1989 = vmatprep.subr.bf16.mxu0 %v1988_v36  ;;  %2245 = vmatprep.subr.bf16.mxu1 %v2244_v37  ;;  %v663_v36 = vld [vmem:[#allocation8 + $0x5f8] sm:$0xff]  ;;  %v2006_v37 = vpack.c.bf16 %v652_v27, %v648_v26  ;;  %v2847_v42 = vpop.f32.mrb[3].mxu1  ;;  %v2008_v43 = vpack.c.bf16 %v661_v33, %v657_v31  ;;  %v689_v26 = vld [vmem:[#allocation8 + $0x6c8] sm:$0xff]  ;;  %v688_v31 = vld [vmem:[#allocation8 + $0x6c0] sm:$0xff] }
 0x15b   :  { %v2264_v44 = vpack.c.bf16 %v663_v36, %v659_v34  ;;  %v693_v27 = vld [vmem:[#allocation8 + $0x6e8] sm:$0xff]  ;;  %v692_v33 = vld [vmem:[#allocation8 + $0x6e0] sm:$0xff] }
 0x15c   :  { %v2024_v34 = vpack.c.bf16 %v693_v27, %v689_v26  ;;  %v705_v53 = vld [vmem:[#allocation8 + $0x748] sm:$0xff]  ;;  %v708_v2 = vld [vmem:[#allocation8 + $0x760] sm:$0xff] }
 0x15d   :  { %1991 = vmatpush1.bf16.msra.mxu0 %v1990_v45  ;;  %2247 = vmatpush1.bf16.msra.mxu1 %v2246_v46  ;;  %v658_v45 = vld [vmem:[#allocation8 + $0x5d0] sm:$0xff]  ;;  %v709_v54 = vld [vmem:[#allocation8 + $0x768] sm:$0xff]  ;;  %v712_v14 = vld [vmem:[#allocation8 + $0x780] sm:$0xff] }
 0x15e   :  { %1993 = vmatprep.subr.bf16.mxu0 %v1992_v49  ;;  %2249 = vmatprep.subr.bf16.mxu1 %v2248_v50  ;;  %v662_v46 = vld [vmem:[#allocation8 + $0x5f0] sm:$0xff]  ;;  %v667_v49 = vld [vmem:[#allocation8 + $0x618] sm:$0xff]  ;;  %v713_v7 = vld [vmem:[#allocation8 + $0x788] sm:$0xff] }
 0x15f   :  { %v671_v50 = vld [vmem:[#allocation8 + $0x638] sm:$0xff]  ;;  %v2266_v52 = vpack.c.bf16 %v662_v46, %v658_v45  ;;  %v2026_v45 = vpack.c.bf16 %v692_v33, %v688_v31  ;;  %v717_v0 = vld [vmem:[#allocation8 + $0x7a8] sm:$0xff]  ;;  %v722_v33 = vld [vmem:[#allocation8 + $0x7d0] sm:$0xff] }
 0x160   :  { %v2268_v56 = vpack.c.bf16 %v671_v50, %v667_v49  ;;  %v2028_v49 = vpack.c.bf16 %v701_v40, %v697_v39  ;;  %v721_v20 = vld [vmem:[#allocation8 + $0x7c8] sm:$0xff]  ;;  %v735_v39 = vld [vmem:[#allocation8 + $0x838] sm:$0xff] }
 0x161   :  { %1995 = vmatpush1.bf16.msra.mxu0 %v1994_v61  ;;  %2251 = vmatpush1.bf16.msra.mxu1 %v2250_v63  ;;  %v666_v61 = vld [vmem:[#allocation8 + $0x610] sm:$0xff] }
 0x162   :  { %1997 = vmatprep.subr.bf16.mxu0 %v1996_v3  ;;  %2253 = vmatprep.subr.bf16.mxu1 %v2252_v4  ;;  %v670_v63 = vld [vmem:[#allocation8 + $0x630] sm:$0xff]  ;;  %v675_v3 = vld [vmem:[#allocation8 + $0x658] sm:$0xff] }
 0x163   :  { %v679_v4 = vld [vmem:[#allocation8 + $0x678] sm:$0xff]  ;;  %v2270_v6 = vpack.c.bf16 %v670_v63, %v666_v61  ;;  %v2030_v61 = vpack.c.bf16 %v700_v48, %v696_v47  ;;  %v732_v47 = vld [vmem:[#allocation8 + $0x820] sm:$0xff] }
 0x164   :  { %v2272_v9 = vpack.c.bf16 %v679_v4, %v675_v3  ;;  %v2032_v3 = vpack.c.bf16 %v709_v54, %v705_v53  ;;  %v741_v53 = vld [vmem:[#allocation8 + $0x868] sm:$0xff]  ;;  %v739_v54 = vld [vmem:[#allocation8 + $0x858] sm:$0xff] }
 0x165   :  { %1999 = vmatpush1.bf16.msra.mxu0 %v1998_v10  ;;  %2255 = vmatpush1.bf16.msra.mxu1 %v2254_v11  ;;  %v674_v10 = vld [vmem:[#allocation8 + $0x650] sm:$0xff] }
 0x166   :  { %2001 = vmatprep.subr.bf16.mxu0 %v2000_v15  ;;  %2257 = vmatprep.subr.bf16.mxu1 %v2256_v16  ;;  %v678_v11 = vld [vmem:[#allocation8 + $0x670] sm:$0xff]  ;;  %v683_v15 = vld [vmem:[#allocation8 + $0x698] sm:$0xff] }
 0x167   :  { %v687_v16 = vld [vmem:[#allocation8 + $0x6b8] sm:$0xff]  ;;  %v2274_v18 = vpack.c.bf16 %v678_v11, %v674_v10  ;;  %v146_v10 = vsub.s32 2, %v2823_v57  ;;  %v2034_v11 = vpack.c.bf16 %v708_v2, %v704_v1  ;;  %v740_v1 = vld [vmem:[#allocation8 + $0x860] sm:$0xff] }
 0x168   :  { %v2276_v22 = vpack.c.bf16 %v687_v16, %v683_v15  ;;  %v716_v15 = vld [vmem:[#allocation8 + $0x7a0] sm:$0xff]  ;;  %v2036_v16 = vpack.c.bf16 %v717_v0, %v713_v7  ;;  %v749_v7 = vld [vmem:[#allocation8 + $0x8a8] sm:$0xff]  ;;  %v747_v0 = vld [vmem:[#allocation8 + $0x898] sm:$0xff] }
 0x169   :  { %2003 = vmatpush1.bf16.msra.mxu0 %v2002_v23  ;;  %2259 = vmatpush1.bf16.msra.mxu1 %v2258_v24  ;;  %v682_v23 = vld [vmem:[#allocation8 + $0x690] sm:$0xff]  ;;  %v147_v26 = vrot.slane %v2826_v59, %v146_v10  ;;  %v2038_v27 = vpack.c.bf16 %v716_v15, %v712_v14  ;;  %v748_v14 = vld [vmem:[#allocation8 + $0x8a0] sm:$0xff] }
 0x16a   :  { %2005 = vmatprep.subr.bf16.mxu0 %v2004_v28  ;;  %2261 = vmatprep.subr.bf16.mxu1 %v2260_v29  ;;  %v686_v24 = vld [vmem:[#allocation8 + $0x6b0] sm:$0xff]  ;;  %v691_v28 = vld [vmem:[#allocation8 + $0x6d8] sm:$0xff] }
 0x16b   :  { %v695_v29 = vld [vmem:[#allocation8 + $0x6f8] sm:$0xff]  ;;  %v2278_v25 = vpack.c.bf16 %v686_v24, %v682_v23  ;;  %v158_v24 = vsub.s32 5, %v2823_v57 }
 0x16c   :  { %v2280_v36 = vpack.c.bf16 %v695_v29, %v691_v28  ;;  %v727_v23 = vld [vmem:[#allocation8 + $0x7f8] sm:$0xff]  ;;  %v720_v29 = vld [vmem:[#allocation8 + $0x7c0] sm:$0xff] }
 0x16d   :  { %2007 = vmatpush1.bf16.msra.mxu0 %v2006_v37  ;;  %2263 = vmatpush1.bf16.msra.mxu1 %v2262_v38  ;;  %v690_v37 = vld [vmem:[#allocation8 + $0x6d0] sm:$0xff]  ;;  %v159_v40 = vrot.slane %v2826_v59, %v158_v24 }
 0x16e   :  { %2009 = vmatprep.subr.bf16.mxu0 %v2008_v43  ;;  %2265 = vmatprep.subr.bf16.mxu1 %v2264_v44  ;;  %v694_v38 = vld [vmem:[#allocation8 + $0x6f0] sm:$0xff]  ;;  %v699_v43 = vld [vmem:[#allocation8 + $0x718] sm:$0xff] }
 0x16f   :  { %v703_v44 = vld [vmem:[#allocation8 + $0x738] sm:$0xff]  ;;  %v2282_v46 = vpack.c.bf16 %v694_v38, %v690_v37  ;;  %v733_v37 = vld [vmem:[#allocation8 + $0x828] sm:$0xff]  ;;  %v391_v59 = vadd.f32 %v2843_v41, %v159_v40  ;;  %v764_v40 = vld [vmem:[#allocation8 + $0x920] sm:$0xff] }
 0x170   :  { %v2284_v50 = vpack.c.bf16 %v703_v44, %v699_v43  ;;  %v731_v38 = vld [vmem:[#allocation8 + $0x818] sm:$0xff]  ;;  %v318_v43 = vadd.f32 %v2839_v13, %v147_v26  ;;  %v752_v26 = vld [vmem:[#allocation8 + $0x8c0] sm:$0xff] }
 0x171   :  { %2011 = vmatpush1.bf16.msra.mxu0 %v2010_v51  ;;  %2267 = vmatpush1.bf16.msra.mxu1 %v2266_v52  ;;  %v698_v51 = vld [vmem:[#allocation8 + $0x710] sm:$0xff] }
 0x172   :  { %2013 = vmatprep.subr.bf16.mxu0 %v2012_v55  ;;  %2269 = vmatprep.subr.bf16.mxu1 %v2268_v56  ;;  %v702_v52 = vld [vmem:[#allocation8 + $0x730] sm:$0xff]  ;;  %v707_v55 = vld [vmem:[#allocation8 + $0x758] sm:$0xff] }
 0x173   :  { %v711_v56 = vld [vmem:[#allocation8 + $0x778] sm:$0xff]  ;;  %v2286_v63 = vpack.c.bf16 %v702_v52, %v698_v51  ;;  %v734_v51 = vld [vmem:[#allocation8 + $0x830] sm:$0xff]  ;;  %v737_v52 = vld [vmem:[#allocation8 + $0x848] sm:$0xff] }
 0x174   :  { %v2288_v4 = vpack.c.bf16 %v711_v56, %v707_v55  ;;  %v743_v55 = vld [vmem:[#allocation8 + $0x878] sm:$0xff]  ;;  %v466_v56 = vmax.f32 %v318_v43, 0.0  ;;  %v2048_v2 = vpack.c.bf16 %v741_v53, %v737_v52  ;;  %v768_v53 = vld [vmem:[#allocation8 + $0x940] sm:$0xff] }
 0x175   :  { %2015 = vmatpush1.bf16.msra.mxu0 %v2014_v5  ;;  %2271 = vmatpush1.bf16.msra.mxu1 %v2270_v6  ;;  %v706_v5 = vld [vmem:[#allocation8 + $0x750] sm:$0xff] }
 0x176   :  { %2017 = vmatprep.subr.bf16.mxu0 %v2016_v8  ;;  %2273 = vmatprep.subr.bf16.mxu1 %v2272_v9  ;;  %v710_v6 = vld [vmem:[#allocation8 + $0x770] sm:$0xff]  ;;  %v715_v8 = vld [vmem:[#allocation8 + $0x798] sm:$0xff] }
 0x177   :  { %v719_v9 = vld [vmem:[#allocation8 + $0x7b8] sm:$0xff]  ;;  %v2290_v12 = vpack.c.bf16 %v710_v6, %v706_v5  ;;  %v742_v5 = vld [vmem:[#allocation8 + $0x870] sm:$0xff]  ;;  %v745_v6 = vld [vmem:[#allocation8 + $0x888] sm:$0xff] }
 0x178   :  { %v2052_v15 = vpack.c.bf16 %v749_v7, %v745_v6  ;;  %v780_v6 = vld [vmem:[#allocation8 + $0x9a0] sm:$0xff] }
 0x179   :  { %2019 = vmatpush1.bf16.msra.mxu0 %v2018_v17  ;;  %2275 = vmatpush1.bf16.msra.mxu1 %v2274_v18  ;;  %v2292_v17 = vpack.c.bf16 %v719_v9, %v715_v8  ;;  %v714_v18 = vld [vmem:[#allocation8 + $0x790] sm:$0xff]  ;;  %v751_v8 = vld [vmem:[#allocation8 + $0x8b8] sm:$0xff]  ;;  %v469_v9 = vmax.f32 %v391_v59, 0.0 }
 0x17a   :  { %2021 = vmatprep.subr.bf16.mxu0 %v2020_v21  ;;  %2277 = vmatprep.subr.bf16.mxu1 %v2276_v22  ;;  %v725_v21 = vld [vmem:[#allocation8 + $0x7e8] sm:$0xff]  ;;  %v723_v22 = vld [vmem:[#allocation8 + $0x7d8] sm:$0xff]  ;;  %v2294_v28 = vpack.c.bf16 %v718_v19, %v714_v18  ;;  %v750_v18 = vld [vmem:[#allocation8 + $0x8b0] sm:$0xff] }
 0x17b   :  { %v2296_v31 = vpack.c.bf16 %v727_v23, %v723_v22  ;;  %v753_v19 = vld [vmem:[#allocation8 + $0x8c8] sm:$0xff]  ;;  %v759_v22 = vld [vmem:[#allocation8 + $0x8f8] sm:$0xff] }
 0x17d   :  { %2023 = vmatpush1.bf16.msra.mxu0 %v2022_v30  ;;  %2279 = vmatpush1.bf16.msra.mxu1 %v2278_v25  ;;  %v724_v30 = vld [vmem:[#allocation8 + $0x7e0] sm:$0xff]  ;;  %v2040_v25 = vpack.c.bf16 %v725_v21, %v721_v20  ;;  %v757_v20 = vld [vmem:[#allocation8 + $0x8e8] sm:$0xff]  ;;  %v755_v21 = vld [vmem:[#allocation8 + $0x8d8] sm:$0xff] }
 0x17e   :  { %2025 = vmatprep.subr.bf16.mxu0 %v2024_v34  ;;  %2281 = vmatprep.subr.bf16.mxu1 %v2280_v36  ;;  %v726_v34 = vld [vmem:[#allocation8 + $0x7f0] sm:$0xff]  ;;  %v729_v36 = vld [vmem:[#allocation8 + $0x808] sm:$0xff]  ;;  %v2042_v44 = vpack.c.bf16 %v724_v30, %v720_v29  ;;  %v2312_v29 = vpack.c.bf16 %v759_v22, %v755_v21 }
 0x17f   :  { %v2044_v48 = vpack.c.bf16 %v733_v37, %v729_v36  ;;  %v754_v30 = vld [vmem:[#allocation8 + $0x8d0] sm:$0xff]  ;;  %v767_v36 = vld [vmem:[#allocation8 + $0x938] sm:$0xff] }
 0x180   :  { %v786_v21 = vld [vmem:[#allocation8 + $0x9d0] sm:$0xff] }
 0x181   :  { %2027 = vmatpush1.bf16.msra.mxu0 %v2026_v45  ;;  %2283 = vmatpush1.bf16.msra.mxu1 %v2282_v46  ;;  %v2298_v45 = vpack.c.bf16 %v726_v34, %v722_v33  ;;  %v728_v46 = vld [vmem:[#allocation8 + $0x800] sm:$0xff]  ;;  %v765_v33 = vld [vmem:[#allocation8 + $0x928] sm:$0xff]  ;;  %v763_v34 = vld [vmem:[#allocation8 + $0x918] sm:$0xff] }
 0x182   :  { %2029 = vmatprep.subr.bf16.mxu0 %v2028_v49  ;;  %2285 = vmatprep.subr.bf16.mxu1 %v2284_v50  ;;  %v2300_v49 = vpack.c.bf16 %v735_v39, %v731_v38  ;;  %v730_v50 = vld [vmem:[#allocation8 + $0x810] sm:$0xff]  ;;  %v2046_v13 = vpack.c.bf16 %v732_v47, %v728_v46  ;;  %v760_v39 = vld [vmem:[#allocation8 + $0x900] sm:$0xff]  ;;  %v769_v47 = vld [vmem:[#allocation8 + $0x948] sm:$0xff] }
 0x183   :  { %v766_v46 = vld [vmem:[#allocation8 + $0x930] sm:$0xff] }
 0x184   :  { %v790_v22 = vld [vmem:[#allocation8 + $0x9f0] sm:$0xff] }
 0x185   :  { %2031 = vmatpush1.bf16.msra.mxu0 %v2030_v61  ;;  %2287 = vmatpush1.bf16.msra.mxu1 %v2286_v63  ;;  %v2302_v61 = vpack.c.bf16 %v734_v51, %v730_v50  ;;  %v736_v63 = vld [vmem:[#allocation8 + $0x840] sm:$0xff]  ;;  %v775_v50 = vld [vmem:[#allocation8 + $0x978] sm:$0xff]  ;;  %v2062_v51 = vpack.c.bf16 %v764_v40, %v760_v39 }
 0x186   :  { %2033 = vmatprep.subr.bf16.mxu0 %v2032_v3  ;;  %2289 = vmatprep.subr.bf16.mxu1 %v2288_v4  ;;  %v2304_v3 = vpack.c.bf16 %v743_v55, %v739_v54  ;;  %v738_v4 = vld [vmem:[#allocation8 + $0x850] sm:$0xff]  ;;  %v2050_v41 = vpack.c.bf16 %v740_v1, %v736_v63  ;;  %v772_v54 = vld [vmem:[#allocation8 + $0x960] sm:$0xff]  ;;  %v781_v63 = vld [vmem:[#allocation8 + $0x9a8] sm:$0xff] }
 0x187   :  { %v779_v1 = vld [vmem:[#allocation8 + $0x998] sm:$0xff] }
 0x188   :  { %v803_v39 = vld [vmem:[#allocation8 + $0xa58] sm:$0xff] }
 0x189   :  { %2035 = vmatpush1.bf16.msra.mxu0 %v2034_v11  ;;  %2291 = vmatpush1.bf16.msra.mxu1 %v2290_v12  ;;  %v2306_v11 = vpack.c.bf16 %v742_v5, %v738_v4  ;;  %v744_v12 = vld [vmem:[#allocation8 + $0x880] sm:$0xff]  ;;  %v807_v40 = vld [vmem:[#allocation8 + $0xa78] sm:$0xff] }
 0x18a   :  { %2037 = vmatprep.subr.bf16.mxu0 %v2036_v16  ;;  %2293 = vmatprep.subr.bf16.mxu1 %v2292_v17  ;;  %v2308_v16 = vpack.c.bf16 %v751_v8, %v747_v0  ;;  %v746_v17 = vld [vmem:[#allocation8 + $0x890] sm:$0xff]  ;;  %v2054_v23 = vpack.c.bf16 %v748_v14, %v744_v12  ;;  %v776_v5 = vld [vmem:[#allocation8 + $0x980] sm:$0xff]  ;;  %v787_v12 = vld [vmem:[#allocation8 + $0x9d8] sm:$0xff] }
 0x18b   :  { %v2310_v24 = vpack.c.bf16 %v750_v18, %v746_v17  ;;  %v778_v8 = vld [vmem:[#allocation8 + $0x990] sm:$0xff]  ;;  %v791_v14 = vld [vmem:[#allocation8 + $0x9f8] sm:$0xff]  ;;  %v784_v17 = vld [vmem:[#allocation8 + $0x9c0] sm:$0xff] }
 0x18c   :  { %v788_v18 = vld [vmem:[#allocation8 + $0x9e0] sm:$0xff] }
 0x18d   :  { %2039 = vmatpush1.bf16.msra.mxu0 %v2038_v27  ;;  %2295 = vmatpush1.bf16.msra.mxu1 %v2294_v28  ;;  %v756_v27 = vld [vmem:[#allocation8 + $0x8e0] sm:$0xff]  ;;  %v2056_v28 = vpack.c.bf16 %v757_v20, %v753_v19  ;;  %v2328_v20 = vpack.c.bf16 %v791_v14, %v787_v12  ;;  %v818_v12 = vld [vmem:[#allocation8 + $0xad0] sm:$0xff] }
 0x18e   :  { %2041 = vmatprep.subr.bf16.mxu0 %v2040_v25  ;;  %2297 = vmatprep.subr.bf16.mxu1 %v2296_v31  ;;  %v758_v25 = vld [vmem:[#allocation8 + $0x8f0] sm:$0xff]  ;;  %v761_v31 = vld [vmem:[#allocation8 + $0x908] sm:$0xff]  ;;  %v2058_v37 = vpack.c.bf16 %v756_v27, %v752_v26  ;;  %v795_v26 = vld [vmem:[#allocation8 + $0xa18] sm:$0xff] }
 0x18f   :  { %v2314_v38 = vpack.c.bf16 %v758_v25, %v754_v30  ;;  %v2060_v43 = vpack.c.bf16 %v765_v33, %v761_v31  ;;  %v799_v27 = vld [vmem:[#allocation8 + $0xa38] sm:$0xff]  ;;  %v792_v30 = vld [vmem:[#allocation8 + $0xa00] sm:$0xff]  ;;  %v822_v14 = vld [vmem:[#allocation8 + $0xaf0] sm:$0xff] }
 0x190   :  { %v796_v25 = vld [vmem:[#allocation8 + $0xa20] sm:$0xff]  ;;  %v2332_v33 = vpack.c.bf16 %v799_v27, %v795_v26  ;;  %v826_v26 = vld [vmem:[#allocation8 + $0xb10] sm:$0xff] }
 0x191   :  { %2043 = vmatpush1.bf16.msra.mxu0 %v2042_v44  ;;  %2299 = vmatpush1.bf16.msra.mxu1 %v2298_v45  ;;  %v2316_v44 = vpack.c.bf16 %v767_v36, %v763_v34  ;;  %v762_v45 = vld [vmem:[#allocation8 + $0x910] sm:$0xff] }
 0x192   :  { %2045 = vmatprep.subr.bf16.mxu0 %v2044_v48  ;;  %2301 = vmatprep.subr.bf16.mxu1 %v2300_v49  ;;  %v773_v48 = vld [vmem:[#allocation8 + $0x968] sm:$0xff]  ;;  %v771_v49 = vld [vmem:[#allocation8 + $0x958] sm:$0xff]  ;;  %v2318_v52 = vpack.c.bf16 %v766_v46, %v762_v45  ;;  %v794_v34 = vld [vmem:[#allocation8 + $0xa10] sm:$0xff] }
 0x193   :  { %v2064_v55 = vpack.c.bf16 %v773_v48, %v769_v47  ;;  %v2320_v59 = vpack.c.bf16 %v775_v50, %v771_v49  ;;  %v798_v36 = vld [vmem:[#allocation8 + $0xa30] sm:$0xff]  ;;  %v800_v45 = vld [vmem:[#allocation8 + $0xa40] sm:$0xff]  ;;  %v2336_v48 = vpack.c.bf16 %v807_v40, %v803_v39 }
 0x194   :  { %1142 = vmatmul.mubr.f32.vlgmr.msra.gmra.mrb[4].mxu0 %v466_v56  ;;  %1426 = vmatmul.mubr.f32.vlgmr.msra.gmra.mrb[4].mxu1 %v466_v56  ;;  %v770_v56 = vld [vmem:[#allocation8 + $0x950] sm:$0xff]  ;;  %v804_v46 = vld [vmem:[#allocation8 + $0xa60] sm:$0xff] }
 0x195   :  { %2047 = vmatpush1.bf16.msra.mxu0 %v2046_v13  ;;  %2303 = vmatpush1.bf16.msra.mxu1 %v2302_v61  ;;  %v774_v13 = vld [vmem:[#allocation8 + $0x970] sm:$0xff]  ;;  %v777_v61 = vld [vmem:[#allocation8 + $0x988] sm:$0xff] }
 0x196   :  { %2049 = vmatprep.subr.bf16.mxu0 %v2048_v2  ;;  %2305 = vmatprep.subr.bf16.mxu1 %v2304_v3  ;;  %v783_v2 = vld [vmem:[#allocation8 + $0x9b8] sm:$0xff]  ;;  %v2066_v3 = vpack.c.bf16 %v772_v54, %v768_v53  ;;  %v2322_v4 = vpack.c.bf16 %v774_v13, %v770_v56  ;;  %v2068_v7 = vpack.c.bf16 %v781_v63, %v777_v61  ;;  %v802_v49 = vld [vmem:[#allocation8 + $0xa50] sm:$0xff]  ;;  %v808_v56 = vld [vmem:[#allocation8 + $0xa80] sm:$0xff] }
 0x197   :  { %1212 = vmatprep.mubr.f32.mxu0 %v469_v9  ;;  %1496 = vmatprep.mubr.f32.mxu1 %v469_v9  ;;  %v2324_v0 = vpack.c.bf16 %v783_v2, %v779_v1  ;;  %v782_v9 = vld [vmem:[#allocation8 + $0x9b0] sm:$0xff]  ;;  %v811_v53 = vld [vmem:[#allocation8 + $0xa98] sm:$0xff]  ;;  %v812_v13 = vld [vmem:[#allocation8 + $0xaa0] sm:$0xff] }
 0x198   :  { %v806_v50 = vld [vmem:[#allocation8 + $0xa70] sm:$0xff]  ;;  %v815_v54 = vld [vmem:[#allocation8 + $0xab8] sm:$0xff] }
 0x199   :  { %2051 = vmatpush1.bf16.msra.mxu0 %v2050_v41  ;;  %2307 = vmatpush1.bf16.msra.mxu1 %v2306_v11  ;;  %v785_v41 = vld [vmem:[#allocation8 + $0x9c8] sm:$0xff]  ;;  %v2340_v63 = vpack.c.bf16 %v815_v54, %v811_v53  ;;  %v810_v1 = vld [vmem:[#allocation8 + $0xa90] sm:$0xff] }
 0x19a   :  { %2053 = vmatprep.subr.bf16.mxu0 %v2052_v15  ;;  %2309 = vmatprep.subr.bf16.mxu1 %v2308_v16  ;;  %v789_v11 = vld [vmem:[#allocation8 + $0x9e8] sm:$0xff]  ;;  %v2070_v15 = vpack.c.bf16 %v780_v6, %v776_v5  ;;  %v2326_v16 = vpack.c.bf16 %v782_v9, %v778_v8  ;;  %v814_v2 = vld [vmem:[#allocation8 + $0xab0] sm:$0xff]  ;;  %v819_v5 = vld [vmem:[#allocation8 + $0xad8] sm:$0xff] }
 0x19b   :  { %v2072_v19 = vpack.c.bf16 %v789_v11, %v785_v41  ;;  %v823_v6 = vld [vmem:[#allocation8 + $0xaf8] sm:$0xff]  ;;  %v816_v8 = vld [vmem:[#allocation8 + $0xac0] sm:$0xff]  ;;  %v830_v27 = vld [vmem:[#allocation8 + $0xb30] sm:$0xff] }
 0x19c   :  { %v820_v9 = vld [vmem:[#allocation8 + $0xae0] sm:$0xff]  ;;  %v2344_v11 = vpack.c.bf16 %v823_v6, %v819_v5  ;;  %v834_v39 = vld [vmem:[#allocation8 + $0xb50] sm:$0xff] }
 0x19d   :  { %2055 = vmatpush1.bf16.msra.mxu0 %v2054_v23  ;;  %2311 = vmatpush1.bf16.msra.mxu1 %v2310_v24  ;;  %v793_v23 = vld [vmem:[#allocation8 + $0xa08] sm:$0xff]  ;;  %v838_v40 = vld [vmem:[#allocation8 + $0xb70] sm:$0xff]  ;;  %v848_v5 = vld [vmem:[#allocation8 + $0xbc0] sm:$0xff] }
 0x19e   :  { %2057 = vmatprep.subr.bf16.mxu0 %v2056_v28  ;;  %2313 = vmatprep.subr.bf16.mxu1 %v2312_v29  ;;  %v797_v24 = vld [vmem:[#allocation8 + $0xa28] sm:$0xff]  ;;  %v2074_v28 = vpack.c.bf16 %v788_v18, %v784_v17  ;;  %v2330_v29 = vpack.c.bf16 %v790_v22, %v786_v21  ;;  %v827_v17 = vld [vmem:[#allocation8 + $0xb18] sm:$0xff]  ;;  %v824_v21 = vld [vmem:[#allocation8 + $0xb00] sm:$0xff] }
 0x19f   :  { %v2076_v31 = vpack.c.bf16 %v797_v24, %v793_v23  ;;  %v831_v18 = vld [vmem:[#allocation8 + $0xb38] sm:$0xff]  ;;  %v828_v22 = vld [vmem:[#allocation8 + $0xb20] sm:$0xff]  ;;  %v842_v54 = vld [vmem:[#allocation8 + $0xb90] sm:$0xff] }
 0x1a0   :  { %v2348_v24 = vpack.c.bf16 %v831_v18, %v827_v17  ;;  %v852_v6 = vld [vmem:[#allocation8 + $0xbe0] sm:$0xff] }
 0x1a1   :  { %2059 = vmatpush1.bf16.msra.mxu0 %v2058_v37  ;;  %2315 = vmatpush1.bf16.msra.mxu1 %v2314_v38  ;;  %v801_v37 = vld [vmem:[#allocation8 + $0xa48] sm:$0xff]  ;;  %v2106_v17 = vpack.c.bf16 %v852_v6, %v848_v5  ;;  %v882_v5 = vld [vmem:[#allocation8 + $0xcd0] sm:$0xff] }
 0x1a2   :  { %2061 = vmatprep.subr.bf16.mxu0 %v2060_v43  ;;  %2317 = vmatprep.subr.bf16.mxu1 %v2316_v44  ;;  %v805_v38 = vld [vmem:[#allocation8 + $0xa68] sm:$0xff]  ;;  %v2078_v43 = vpack.c.bf16 %v796_v25, %v792_v30  ;;  %v2334_v44 = vpack.c.bf16 %v798_v36, %v794_v34  ;;  %v835_v30 = vld [vmem:[#allocation8 + $0xb58] sm:$0xff]  ;;  %v832_v34 = vld [vmem:[#allocation8 + $0xb40] sm:$0xff] }
 0x1a3   :  { %v2080_v47 = vpack.c.bf16 %v805_v38, %v801_v37  ;;  %v839_v25 = vld [vmem:[#allocation8 + $0xb78] sm:$0xff]  ;;  %v836_v36 = vld [vmem:[#allocation8 + $0xb60] sm:$0xff]  ;;  %v886_v6 = vld [vmem:[#allocation8 + $0xcf0] sm:$0xff] }
 0x1a4   :  { %v2352_v38 = vpack.c.bf16 %v839_v25, %v835_v30 }
 0x1a5   :  { %2063 = vmatpush1.bf16.msra.mxu0 %v2062_v51  ;;  %2319 = vmatpush1.bf16.msra.mxu1 %v2318_v52  ;;  %v809_v51 = vld [vmem:[#allocation8 + $0xa88] sm:$0xff] }
 0x1a6   :  { %2065 = vmatprep.subr.bf16.mxu0 %v2064_v55  ;;  %2321 = vmatprep.subr.bf16.mxu1 %v2320_v59  ;;  %v813_v52 = vld [vmem:[#allocation8 + $0xaa8] sm:$0xff]  ;;  %v2082_v55 = vpack.c.bf16 %v804_v46, %v800_v45  ;;  %v2338_v59 = vpack.c.bf16 %v806_v50, %v802_v49  ;;  %v843_v45 = vld [vmem:[#allocation8 + $0xb98] sm:$0xff]  ;;  %v2354_v49 = vpack.c.bf16 %v838_v40, %v834_v39  ;;  %v840_v50 = vld [vmem:[#allocation8 + $0xb80] sm:$0xff] }
 0x1a7   :  { %v2084_v61 = vpack.c.bf16 %v813_v52, %v809_v51  ;;  %v847_v46 = vld [vmem:[#allocation8 + $0xbb8] sm:$0xff]  ;;  %v844_v51 = vld [vmem:[#allocation8 + $0xba0] sm:$0xff]  ;;  %v870_v39 = vld [vmem:[#allocation8 + $0xc70] sm:$0xff] }
 0x1a8   :  { %v2356_v53 = vpack.c.bf16 %v847_v46, %v843_v45  ;;  %v873_v40 = vld [vmem:[#allocation8 + $0xc88] sm:$0xff]  ;;  %v879_v45 = vld [vmem:[#allocation8 + $0xcb8] sm:$0xff] }
 0x1a9   :  { %2067 = vmatpush1.bf16.msra.mxu0 %v2066_v3  ;;  %2323 = vmatpush1.bf16.msra.mxu1 %v2322_v4  ;;  %v817_v3 = vld [vmem:[#allocation8 + $0xac8] sm:$0xff] }
 0x1aa   :  { %2069 = vmatprep.subr.bf16.mxu0 %v2068_v7  ;;  %2325 = vmatprep.subr.bf16.mxu1 %v2324_v0  ;;  %v821_v4 = vld [vmem:[#allocation8 + $0xae8] sm:$0xff]  ;;  %v2086_v7 = vpack.c.bf16 %v812_v13, %v808_v56  ;;  %v2342_v0 = vpack.c.bf16 %v814_v2, %v810_v1  ;;  %v851_v13 = vld [vmem:[#allocation8 + $0xbd8] sm:$0xff] }
 0x1ab   :  { %v2088_v41 = vpack.c.bf16 %v821_v4, %v817_v3  ;;  %v853_v56 = vld [vmem:[#allocation8 + $0xbe8] sm:$0xff]  ;;  %v2859_v1 = vld [vmem:[#allocation7] sm:$0xff]  ;;  %v2102_v3 = vpack.c.bf16 %v844_v51, %v840_v50 }
 0x1ad   :  { %2071 = vmatpush1.bf16.msra.mxu0 %v2070_v15  ;;  %2327 = vmatpush1.bf16.msra.mxu1 %v2326_v16  ;;  %v825_v15 = vld [vmem:[#allocation8 + $0xb08] sm:$0xff] }
 0x1ae   :  { %2073 = vmatprep.subr.bf16.mxu0 %v2072_v19  ;;  %2329 = vmatprep.subr.bf16.mxu1 %v2328_v20  ;;  %v829_v16 = vld [vmem:[#allocation8 + $0xb28] sm:$0xff]  ;;  %v2090_v19 = vpack.c.bf16 %v820_v9, %v816_v8  ;;  %v2346_v20 = vpack.c.bf16 %v822_v14, %v818_v12  ;;  %v850_v8 = vld [vmem:[#allocation8 + $0xbd0] sm:$0xff]  ;;  %v859_v12 = vld [vmem:[#allocation8 + $0xc18] sm:$0xff] }
 0x1af   :  { %v2092_v23 = vpack.c.bf16 %v829_v16, %v825_v15  ;;  %v854_v9 = vld [vmem:[#allocation8 + $0xbf0] sm:$0xff]  ;;  %v863_v14 = vld [vmem:[#allocation8 + $0xc38] sm:$0xff] }
 0x1b0   :  { %v2362_v18 = vpack.c.bf16 %v854_v9, %v850_v8  ;;  %v891_v8 = vld [vmem:[#allocation8 + $0xd18] sm:$0xff] }
 0x1b1   :  { %2075 = vmatpush1.bf16.msra.mxu0 %v2074_v28  ;;  %2331 = vmatpush1.bf16.msra.mxu1 %v2330_v29  ;;  %v833_v28 = vld [vmem:[#allocation8 + $0xb48] sm:$0xff]  ;;  %v895_v9 = vld [vmem:[#allocation8 + $0xd38] sm:$0xff] }
 0x1b2   :  { %2077 = vmatprep.subr.bf16.mxu0 %v2076_v31  ;;  %2333 = vmatprep.subr.bf16.mxu1 %v2332_v33  ;;  %v837_v29 = vld [vmem:[#allocation8 + $0xb68] sm:$0xff]  ;;  %v2094_v31 = vpack.c.bf16 %v828_v22, %v824_v21  ;;  %v2350_v33 = vpack.c.bf16 %v830_v27, %v826_v26  ;;  %v2364_v22 = vpack.c.bf16 %v863_v14, %v859_v12  ;;  %v888_v12 = vld [vmem:[#allocation8 + $0xd00] sm:$0xff] }
 0x1b3   :  { %v2096_v37 = vpack.c.bf16 %v837_v29, %v833_v28  ;;  %v865_v26 = vld [vmem:[#allocation8 + $0xc48] sm:$0xff]  ;;  %v867_v28 = vld [vmem:[#allocation8 + $0xc58] sm:$0xff]  ;;  %v892_v14 = vld [vmem:[#allocation8 + $0xd20] sm:$0xff] }
 0x1b4   :  { %v869_v27 = vld [vmem:[#allocation8 + $0xc68] sm:$0xff]  ;;  %v871_v29 = vld [vmem:[#allocation8 + $0xc78] sm:$0xff] }
 0x1b5   :  { %2079 = vmatpush1.bf16.msra.mxu0 %v2078_v43  ;;  %2335 = vmatpush1.bf16.msra.mxu1 %v2334_v44  ;;  %v841_v43 = vld [vmem:[#allocation8 + $0xb88] sm:$0xff] }
 0x1b6   :  { %2081 = vmatprep.subr.bf16.mxu0 %v2080_v47  ;;  %2337 = vmatprep.subr.bf16.mxu1 %v2336_v48  ;;  %v845_v44 = vld [vmem:[#allocation8 + $0xba8] sm:$0xff]  ;;  %v154_v47 = vsub.s32 4, %v2823_v57  ;;  %v2098_v48 = vpack.c.bf16 %v836_v36, %v832_v34  ;;  %v868_v34 = vld [vmem:[#allocation8 + $0xc60] sm:$0xff]  ;;  %v2112_v36 = vpack.c.bf16 %v869_v27, %v865_v26 }
 0x1b7   :  { %v2100_v52 = vpack.c.bf16 %v845_v44, %v841_v43  ;;  %v877_v43 = vld [vmem:[#allocation8 + $0xca8] sm:$0xff]  ;;  %v875_v44 = vld [vmem:[#allocation8 + $0xc98] sm:$0xff]  ;;  %v896_v26 = vld [vmem:[#allocation8 + $0xd40] sm:$0xff] }
 0x1b8   :  { %v155_v2 = vrot.slane %v2859_v1, %v154_v47  ;;  %v2116_v50 = vpack.c.bf16 %v877_v43, %v873_v40  ;;  %v2372_v51 = vpack.c.bf16 %v879_v45, %v875_v44  ;;  %v900_v27 = vld [vmem:[#allocation8 + $0xd60] sm:$0xff]  ;;  %v906_v44 = vld [vmem:[#allocation8 + $0xd90] sm:$0xff] }
 0x1b9   :  { %2083 = vmatpush1.bf16.msra.mxu0 %v2082_v55  ;;  %2339 = vmatpush1.bf16.msra.mxu1 %v2338_v59  ;;  %v846_v55 = vld [vmem:[#allocation8 + $0xbb0] sm:$0xff]  ;;  %v849_v59 = vld [vmem:[#allocation8 + $0xbc8] sm:$0xff] }
 0x1ba   :  { %2085 = vmatprep.subr.bf16.mxu0 %v2084_v61  ;;  %2341 = vmatprep.subr.bf16.mxu1 %v2340_v63  ;;  %v855_v61 = vld [vmem:[#allocation8 + $0xbf8] sm:$0xff]  ;;  %v166_v63 = vsub.s32 7, %v2823_v57  ;;  %v2358_v4 = vpack.c.bf16 %v846_v55, %v842_v54  ;;  %v389_v16 = vadd.f32 %v2841_v35, %v155_v2  ;;  %v881_v54 = vld [vmem:[#allocation8 + $0xcc8] sm:$0xff]  ;;  %v884_v2 = vld [vmem:[#allocation8 + $0xce0] sm:$0xff] }
 0x1bb   :  { %v885_v55 = vld [vmem:[#allocation8 + $0xce8] sm:$0xff]  ;;  %v910_v45 = vld [vmem:[#allocation8 + $0xdb0] sm:$0xff] }
 0x1bc   :  { %v167_v15 = vrot.slane %v2859_v1, %v166_v63  ;;  %v468_v25 = vmax.f32 %v389_v16, 0.0  ;;  %v880_v63 = vld [vmem:[#allocation8 + $0xcc0] sm:$0xff]  ;;  %v2380_v16 = vpack.c.bf16 %v895_v9, %v891_v8  ;;  %v926_v8 = vld [vmem:[#allocation8 + $0xe30] sm:$0xff]  ;;  %v929_v9 = vld [vmem:[#allocation8 + $0xe48] sm:$0xff] }
 0x1bd   :  { %2087 = vmatpush1.bf16.msra.mxu0 %v2086_v7  ;;  %2343 = vmatpush1.bf16.msra.mxu1 %v2342_v0  ;;  %v2104_v7 = vpack.c.bf16 %v853_v56, %v849_v59  ;;  %v2360_v0 = vpack.c.bf16 %v855_v61, %v851_v13  ;;  %v883_v59 = vld [vmem:[#allocation8 + $0xcd8] sm:$0xff] }
 0x1be   :  { %2089 = vmatprep.subr.bf16.mxu0 %v2088_v41  ;;  %2345 = vmatprep.subr.bf16.mxu1 %v2344_v11  ;;  %v857_v41 = vld [vmem:[#allocation8 + $0xc08] sm:$0xff]  ;;  %v462_v30 = vadd.f32 %v2847_v42, %v167_v15  ;;  %v887_v56 = vld [vmem:[#allocation8 + $0xcf8] sm:$0xff] }
 0x1bf   :  { %v861_v11 = vld [vmem:[#allocation8 + $0xc28] sm:$0xff] }
 0x1c0   :  { %v2108_v21 = vpack.c.bf16 %v861_v11, %v857_v41  ;;  %v471_v46 = vmax.f32 %v462_v30, 0.0  ;;  %v2122_v41 = vpack.c.bf16 %v884_v2, %v880_v63  ;;  %v2378_v11 = vpack.c.bf16 %v886_v6, %v882_v5  ;;  %v898_v30 = vld [vmem:[#allocation8 + $0xd50] sm:$0xff]  ;;  %v927_v63 = vld [vmem:[#allocation8 + $0xe38] sm:$0xff]  ;;  %v924_v5 = vld [vmem:[#allocation8 + $0xe20] sm:$0xff] }
 0x1c1   :  { %2091 = vmatpush1.bf16.msra.mxu0 %v2090_v19  ;;  %2347 = vmatpush1.bf16.msra.mxu1 %v2346_v20  ;;  %v856_v19 = vld [vmem:[#allocation8 + $0xc00] sm:$0xff] }
 0x1c2   :  { %2093 = vmatprep.subr.bf16.mxu0 %v2092_v23  ;;  %2349 = vmatprep.subr.bf16.mxu1 %v2348_v24  ;;  %v860_v20 = vld [vmem:[#allocation8 + $0xc20] sm:$0xff]  ;;  %v858_v23 = vld [vmem:[#allocation8 + $0xc10] sm:$0xff] }
 0x1c3   :  { %v862_v24 = vld [vmem:[#allocation8 + $0xc30] sm:$0xff]  ;;  %v2110_v35 = vpack.c.bf16 %v860_v20, %v856_v19  ;;  %v897_v19 = vld [vmem:[#allocation8 + $0xd48] sm:$0xff] }
 0x1c4   :  { %v901_v20 = vld [vmem:[#allocation8 + $0xd68] sm:$0xff] }
 0x1c5   :  { %2095 = vmatpush1.bf16.msra.mxu0 %v2094_v31  ;;  %2351 = vmatpush1.bf16.msra.mxu1 %v2350_v33  ;;  %v2366_v31 = vpack.c.bf16 %v862_v24, %v858_v23  ;;  %v864_v33 = vld [vmem:[#allocation8 + $0xc40] sm:$0xff]  ;;  %v2126_v23 = vpack.c.bf16 %v892_v14, %v888_v12  ;;  %v935_v12 = vld [vmem:[#allocation8 + $0xe78] sm:$0xff] }
 0x1c6   :  { %2097 = vmatprep.subr.bf16.mxu0 %v2096_v37  ;;  %2353 = vmatprep.subr.bf16.mxu1 %v2352_v38  ;;  %v2368_v37 = vpack.c.bf16 %v871_v29, %v867_v28  ;;  %v866_v38 = vld [vmem:[#allocation8 + $0xc50] sm:$0xff]  ;;  %v2114_v42 = vpack.c.bf16 %v868_v34, %v864_v33  ;;  %v2128_v28 = vpack.c.bf16 %v901_v20, %v897_v19  ;;  %v907_v33 = vld [vmem:[#allocation8 + $0xd98] sm:$0xff] }
 0x1c7   :  { %v2370_v47 = vpack.c.bf16 %v870_v39, %v866_v38  ;;  %v911_v34 = vld [vmem:[#allocation8 + $0xdb8] sm:$0xff]  ;;  %v904_v38 = vld [vmem:[#allocation8 + $0xd80] sm:$0xff]  ;;  %v930_v20 = vld [vmem:[#allocation8 + $0xe50] sm:$0xff] }
 0x1c8   :  { %v908_v39 = vld [vmem:[#allocation8 + $0xda0] sm:$0xff]  ;;  %v2388_v43 = vpack.c.bf16 %v911_v34, %v907_v33  ;;  %v942_v33 = vld [vmem:[#allocation8 + $0xeb0] sm:$0xff]  ;;  %v945_v34 = vld [vmem:[#allocation8 + $0xec8] sm:$0xff] }
 0x1c9   :  { %2099 = vmatpush1.bf16.msra.mxu0 %v2098_v48  ;;  %2355 = vmatpush1.bf16.msra.mxu1 %v2354_v49  ;;  %v872_v48 = vld [vmem:[#allocation8 + $0xc80] sm:$0xff] }
 0x1ca   :  { %2101 = vmatprep.subr.bf16.mxu0 %v2100_v52  ;;  %2357 = vmatprep.subr.bf16.mxu1 %v2356_v53  ;;  %v876_v49 = vld [vmem:[#allocation8 + $0xca0] sm:$0xff]  ;;  %v874_v52 = vld [vmem:[#allocation8 + $0xc90] sm:$0xff] }
 0x1cb   :  { %v878_v53 = vld [vmem:[#allocation8 + $0xcb0] sm:$0xff]  ;;  %v2118_v13 = vpack.c.bf16 %v876_v49, %v872_v48  ;;  %v919_v48 = vld [vmem:[#allocation8 + $0xdf8] sm:$0xff]  ;;  %v2134_v49 = vpack.c.bf16 %v908_v39, %v904_v38 }
 0x1cc   :  { %v2374_v61 = vpack.c.bf16 %v878_v53, %v874_v52  ;;  %v916_v52 = vld [vmem:[#allocation8 + $0xde0] sm:$0xff]  ;;  %v951_v38 = vld [vmem:[#allocation8 + $0xef8] sm:$0xff] }
 0x1cd   :  { %2103 = vmatpush1.bf16.msra.mxu0 %v2102_v3  ;;  %2359 = vmatpush1.bf16.msra.mxu1 %v2358_v4  ;;  %v2120_v3 = vpack.c.bf16 %v885_v55, %v881_v54  ;;  %v2376_v4 = vpack.c.bf16 %v887_v56, %v883_v59  ;;  %v914_v55 = vld [vmem:[#allocation8 + $0xdd0] sm:$0xff]  ;;  %v921_v56 = vld [vmem:[#allocation8 + $0xe08] sm:$0xff] }
 0x1ce   :  { %2105 = vmatprep.subr.bf16.mxu0 %v2104_v7  ;;  %2361 = vmatprep.subr.bf16.mxu1 %v2360_v0  ;;  %v889_v7 = vld [vmem:[#allocation8 + $0xd08] sm:$0xff]  ;;  %v918_v59 = vld [vmem:[#allocation8 + $0xdf0] sm:$0xff] }
 0x1cf   :  { %v893_v0 = vld [vmem:[#allocation8 + $0xd28] sm:$0xff] }
 0x1d0   :  { %v2124_v15 = vpack.c.bf16 %v893_v0, %v889_v7  ;;  %v922_v0 = vld [vmem:[#allocation8 + $0xe10] sm:$0xff] }
 0x1d1   :  { %2107 = vmatpush1.bf16.msra.mxu0 %v2106_v17  ;;  %2363 = vmatpush1.bf16.msra.mxu1 %v2362_v18  ;;  %v890_v17 = vld [vmem:[#allocation8 + $0xd10] sm:$0xff] }
 0x1d2   :  { %2109 = vmatprep.subr.bf16.mxu0 %v2108_v21  ;;  %2365 = vmatprep.subr.bf16.mxu1 %v2364_v22  ;;  %v894_v18 = vld [vmem:[#allocation8 + $0xd30] sm:$0xff]  ;;  %v899_v21 = vld [vmem:[#allocation8 + $0xd58] sm:$0xff] }
 0x1d3   :  { %v903_v22 = vld [vmem:[#allocation8 + $0xd78] sm:$0xff]  ;;  %v2382_v24 = vpack.c.bf16 %v894_v18, %v890_v17  ;;  %v932_v17 = vld [vmem:[#allocation8 + $0xe60] sm:$0xff] }
 0x1d4   :  { %1213 = vmatmul.mubr.f32.vlgmr.msra.gmra.mrb[4].mxu0 %v468_v25  ;;  %1497 = vmatmul.mubr.f32.vlgmr.msra.gmra.mrb[4].mxu1 %v468_v25  ;;  %v2384_v29 = vpack.c.bf16 %v903_v22, %v899_v21  ;;  %v902_v25 = vld [vmem:[#allocation8 + $0xd70] sm:$0xff]  ;;  %v937_v22 = vld [vmem:[#allocation8 + $0xe88] sm:$0xff] }
 0x1d5   :  { %2111 = vmatpush1.bf16.msra.mxu0 %v2110_v35  ;;  %2367 = vmatpush1.bf16.msra.mxu1 %v2366_v31  ;;  %v905_v35 = vld [vmem:[#allocation8 + $0xd88] sm:$0xff]  ;;  %v934_v21 = vld [vmem:[#allocation8 + $0xe70] sm:$0xff] }
 0x1d6   :  { %2113 = vmatprep.subr.bf16.mxu0 %v2112_v36  ;;  %2369 = vmatprep.subr.bf16.mxu1 %v2368_v37  ;;  %v909_v31 = vld [vmem:[#allocation8 + $0xda8] sm:$0xff]  ;;  %v2130_v36 = vpack.c.bf16 %v900_v27, %v896_v26  ;;  %v2386_v37 = vpack.c.bf16 %v902_v25, %v898_v30  ;;  %v943_v26 = vld [vmem:[#allocation8 + $0xeb8] sm:$0xff]  ;;  %v940_v30 = vld [vmem:[#allocation8 + $0xea0] sm:$0xff] }
 0x1d7   :  { %1283 = vmatprep.mubr.f32.mxu0 %v471_v46  ;;  %1567 = vmatprep.mubr.f32.mxu1 %v471_v46  ;;  %v2132_v40 = vpack.c.bf16 %v909_v31, %v905_v35  ;;  %v913_v46 = vld [vmem:[#allocation8 + $0xdc8] sm:$0xff]  ;;  %v938_v31 = vld [vmem:[#allocation8 + $0xe90] sm:$0xff] }
 0x1d9   :  { %2115 = vmatpush1.bf16.msra.mxu0 %v2114_v42  ;;  %2371 = vmatpush1.bf16.msra.mxu1 %v2370_v47  ;;  %v917_v42 = vld [vmem:[#allocation8 + $0xde8] sm:$0xff]  ;;  %v915_v47 = vld [vmem:[#allocation8 + $0xdd8] sm:$0xff] }
 0x1da   :  { %2117 = vmatprep.subr.bf16.mxu0 %v2116_v50  ;;  %2373 = vmatprep.subr.bf16.mxu1 %v2372_v51  ;;  %v2390_v50 = vpack.c.bf16 %v910_v45, %v906_v44  ;;  %v912_v51 = vld [vmem:[#allocation8 + $0xdc0] sm:$0xff]  ;;  %v2136_v53 = vpack.c.bf16 %v917_v42, %v913_v46  ;;  %v2392_v54 = vpack.c.bf16 %v919_v48, %v915_v47  ;;  %v946_v42 = vld [vmem:[#allocation8 + $0xed0] sm:$0xff]  ;;  %v953_v48 = vld [vmem:[#allocation8 + $0xf08] sm:$0xff] }
 0x1db   :  { %v2138_v2 = vpack.c.bf16 %v916_v52, %v912_v51  ;;  %v948_v44 = vld [vmem:[#allocation8 + $0xee0] sm:$0xff]  ;;  %v950_v47 = vld [vmem:[#allocation8 + $0xef0] sm:$0xff]  ;;  %v959_v51 = vld [vmem:[#allocation8 + $0xf38] sm:$0xff] }
 0x1dd   :  { %2119 = vmatpush1.bf16.msra.mxu0 %v2118_v13  ;;  %2375 = vmatpush1.bf16.msra.mxu1 %v2374_v61  ;;  %v925_v13 = vld [vmem:[#allocation8 + $0xe28] sm:$0xff]  ;;  %v923_v61 = vld [vmem:[#allocation8 + $0xe18] sm:$0xff] }
 0x1de   :  { %2121 = vmatprep.subr.bf16.mxu0 %v2120_v3  ;;  %2377 = vmatprep.subr.bf16.mxu1 %v2376_v4  ;;  %v2394_v3 = vpack.c.bf16 %v918_v59, %v914_v55  ;;  %v920_v4 = vld [vmem:[#allocation8 + $0xe00] sm:$0xff]  ;;  %v2140_v6 = vpack.c.bf16 %v925_v13, %v921_v56  ;;  %v2396_v7 = vpack.c.bf16 %v927_v63, %v923_v61  ;;  %v954_v13 = vld [vmem:[#allocation8 + $0xf10] sm:$0xff]  ;;  %v961_v63 = vld [vmem:[#allocation8 + $0xf48] sm:$0xff] }
 0x1df   :  { %v2142_v14 = vpack.c.bf16 %v924_v5, %v920_v4  ;;  %v956_v55 = vld [vmem:[#allocation8 + $0xf20] sm:$0xff]  ;;  %v958_v61 = vld [vmem:[#allocation8 + $0xf30] sm:$0xff]  ;;  %v967_v4 = vld [vmem:[#allocation8 + $0xf78] sm:$0xff] }
 0x1e1   :  { %2123 = vmatpush1.bf16.msra.mxu0 %v2122_v41  ;;  %2379 = vmatpush1.bf16.msra.mxu1 %v2378_v11  ;;  %v933_v41 = vld [vmem:[#allocation8 + $0xe68] sm:$0xff]  ;;  %v931_v11 = vld [vmem:[#allocation8 + $0xe58] sm:$0xff] }
 0x1e2   :  { %2125 = vmatprep.subr.bf16.mxu0 %v2124_v15  ;;  %2381 = vmatprep.subr.bf16.mxu1 %v2380_v16  ;;  %v2398_v15 = vpack.c.bf16 %v926_v8, %v922_v0  ;;  %v928_v16 = vld [vmem:[#allocation8 + $0xe40] sm:$0xff]  ;;  %v2144_v18 = vpack.c.bf16 %v933_v41, %v929_v9  ;;  %v2400_v19 = vpack.c.bf16 %v935_v12, %v931_v11  ;;  %v962_v41 = vld [vmem:[#allocation8 + $0xf50] sm:$0xff]  ;;  %v969_v12 = vld [vmem:[#allocation8 + $0xf88] sm:$0xff] }
 0x1e3   :  { %v2146_v27 = vpack.c.bf16 %v932_v17, %v928_v16  ;;  %v964_v0 = vld [vmem:[#allocation8 + $0xf60] sm:$0xff]  ;;  %v966_v11 = vld [vmem:[#allocation8 + $0xf70] sm:$0xff]  ;;  %v975_v16 = vld [vmem:[#allocation8 + $0xfb8] sm:$0xff] }
 0x1e5   :  { %2127 = vmatpush1.bf16.msra.mxu0 %v2126_v23  ;;  %2383 = vmatpush1.bf16.msra.mxu1 %v2382_v24  ;;  %v941_v23 = vld [vmem:[#allocation8 + $0xea8] sm:$0xff]  ;;  %v939_v24 = vld [vmem:[#allocation8 + $0xe98] sm:$0xff] }
 0x1e6   :  { %2129 = vmatprep.subr.bf16.mxu0 %v2128_v28  ;;  %2385 = vmatprep.subr.bf16.mxu1 %v2384_v29  ;;  %v2402_v28 = vpack.c.bf16 %v934_v21, %v930_v20  ;;  %v936_v29 = vld [vmem:[#allocation8 + $0xe80] sm:$0xff]  ;;  %v2148_v25 = vpack.c.bf16 %v941_v23, %v937_v22  ;;  %v2404_v35 = vpack.c.bf16 %v943_v26, %v939_v24  ;;  %v162_v21 = vsub.s32 6, %v2823_v57  ;;  %v970_v24 = vld [vmem:[#allocation8 + $0xf90] sm:$0xff] }
 0x1e7   :  { %v2150_v39 = vpack.c.bf16 %v940_v30, %v936_v29  ;;  %v972_v20 = vld [vmem:[#allocation8 + $0xfa0] sm:$0xff]  ;;  %v974_v26 = vld [vmem:[#allocation8 + $0xfb0] sm:$0xff]  ;;  %v979_v29 = vld [vmem:[#allocation8 + $0xfd8] sm:$0xff] }
 0x1e8   :  { %v983_v30 = vld [vmem:[#allocation8 + $0xff8] sm:$0xff]  ;;  %v1813_v57 = vld [vmem:[#allocation11] ss:$0 sm:$0xff] }
 0x1e9   :  { %2131 = vmatpush1.bf16.msra.mxu0 %v2130_v36  ;;  %2387 = vmatpush1.bf16.msra.mxu1 %v2386_v37  ;;  %v949_v36 = vld [vmem:[#allocation8 + $0xee8] sm:$0xff]  ;;  %v947_v37 = vld [vmem:[#allocation8 + $0xed8] sm:$0xff] }
 0x1ea   :  { %2133 = vmatprep.subr.bf16.mxu0 %v2132_v40  ;;  %2389 = vmatprep.subr.bf16.mxu1 %v2388_v43  ;;  %v2406_v40 = vpack.c.bf16 %v942_v33, %v938_v31  ;;  %v944_v43 = vld [vmem:[#allocation8 + $0xec0] sm:$0xff]  ;;  %v2152_v45 = vpack.c.bf16 %v949_v36, %v945_v34  ;;  %v2408_v46 = vpack.c.bf16 %v951_v38, %v947_v37  ;;  %v978_v38 = vld [vmem:[#allocation8 + $0xfd0] sm:$0xff] }
 0x1eb   :  { %v2154_v52 = vpack.c.bf16 %v948_v44, %v944_v43  ;;  %v976_v31 = vld [vmem:[#allocation8 + $0xfc0] sm:$0xff]  ;;  %v163_v34 = vrot.slane %v2859_v1, %v162_v21  ;;  %v2424_v37 = vpack.c.bf16 %v983_v30, %v979_v29  ;;  %v1595_v43 = vld [vmem:[%s3085_s5 + $0x88] sm:$0xff]  ;;  %v1626_v44 = vld [vmem:[%s3085_s5 + $0x180] sm:$0xff] }
 0x1ec   :  { %v980_v33 = vld [vmem:[#allocation8 + $0xfe0] sm:$0xff]  ;;  %v1627_v1 = vld [vmem:[%s3085_s5 + $0x188] sm:$0xff]  ;;  %v1633_v21 = vld [vmem:[%s3085_s5 + $0x1b8] sm:$0xff] }
 0x1ed   :  { %2135 = vmatpush1.bf16.msra.mxu0 %v2134_v49  ;;  %2391 = vmatpush1.bf16.msra.mxu1 %v2390_v50  ;;  %v957_v49 = vld [vmem:[#allocation8 + $0xf28] sm:$0xff]  ;;  %v955_v50 = vld [vmem:[#allocation8 + $0xf18] sm:$0xff]  ;;  %v1616_v29 = vld [vmem:[%s3085_s5 + $0x130] sm:$0xff] }
 0x1ee   :  { %2137 = vmatprep.subr.bf16.mxu0 %v2136_v53  ;;  %2393 = vmatprep.subr.bf16.mxu1 %v2392_v54  ;;  %v2410_v53 = vpack.c.bf16 %v950_v47, %v946_v42  ;;  %v952_v54 = vld [vmem:[#allocation8 + $0xf00] sm:$0xff]  ;;  %v2156_v59 = vpack.c.bf16 %v957_v49, %v953_v48  ;;  %v2412_v56 = vpack.c.bf16 %v959_v51, %v955_v50  ;;  %v1578_v42 = vld [vmem:[%s3085_s5] sm:$0xff]  ;;  %v1579_v47 = vld [vmem:[%s3085_s5 + $0x8] sm:$0xff] }
 0x1ef   :  { %v2158_v5 = vpack.c.bf16 %v956_v55, %v952_v54  ;;  %v460_v48 = vadd.f32 %v2845_v32, %v163_v34  ;;  %v2460_v50 = vpack.c.bf16 %v1627_v1, %v1626_v44  ;;  %v1610_v51 = vld [vmem:[%s3085_s5 + $0x100] sm:$0xff]  ;;  %v1597_v32 = vld [vmem:[%s3085_s5 + $0x98] sm:$0xff]  ;;  %v1628_v54 = vld [vmem:[%s3085_s5 + $0x190] sm:$0xff] }
 0x1f0   :  { %v1629_v55 = vld [vmem:[%s3085_s5 + $0x198] sm:$0xff]  ;;  %v1619_v44 = vld [vmem:[%s3085_s5 + $0x148] sm:$0xff]  ;;  %v1604_v1 = vld [vmem:[%s3085_s5 + $0xd0] sm:$0xff] }
 0x1f1   :  { %2139 = vmatpush1.bf16.msra.mxu0 %v2138_v2  ;;  %2395 = vmatpush1.bf16.msra.mxu1 %v2394_v3  ;;  %v965_v2 = vld [vmem:[#allocation8 + $0xf68] sm:$0xff]  ;;  %v963_v3 = vld [vmem:[#allocation8 + $0xf58] sm:$0xff] }
 0x1f2   :  { %2141 = vmatprep.subr.bf16.mxu0 %v2140_v6  ;;  %2397 = vmatprep.subr.bf16.mxu1 %v2396_v7  ;;  %v2414_v6 = vpack.c.bf16 %v958_v61, %v954_v13  ;;  %v960_v7 = vld [vmem:[#allocation8 + $0xf40] sm:$0xff]  ;;  %v2160_v8 = vpack.c.bf16 %v965_v2, %v961_v63  ;;  %v2416_v9 = vpack.c.bf16 %v967_v4, %v963_v3  ;;  %v1581_v61 = vld [vmem:[%s3085_s5 + $0x18] sm:$0xff]  ;;  %v470_v63 = vmax.f32 %v460_v48, 0.0 }
 0x1f3   :  { %v2162_v17 = vpack.c.bf16 %v964_v0, %v960_v7  ;;  %v1580_v13 = vld [vmem:[%s3085_s5 + $0x10] sm:$0xff]  ;;  %v2464_v3 = vpack.c.bf16 %v1629_v55, %v1628_v54  ;;  %v1599_v7 = vld [vmem:[%s3085_s5 + $0xa8] sm:$0xff]  ;;  %v1630_v0 = vld [vmem:[%s3085_s5 + $0x1a0] sm:$0xff] }
 0x1f4   :  { %v1612_v4 = vld [vmem:[%s3085_s5 + $0x110] sm:$0xff]  ;;  %v1617_v30 = vld [vmem:[%s3085_s5 + $0x138] sm:$0xff]  ;;  %v1606_v54 = vld [vmem:[%s3085_s5 + $0xe0] sm:$0xff] }
 0x1f5   :  { %2143 = vmatpush1.bf16.msra.mxu0 %v2142_v14  ;;  %2399 = vmatpush1.bf16.msra.mxu1 %v2398_v15  ;;  %v973_v14 = vld [vmem:[#allocation8 + $0xfa8] sm:$0xff]  ;;  %v971_v15 = vld [vmem:[#allocation8 + $0xf98] sm:$0xff] }
 0x1f6   :  { %2145 = vmatprep.subr.bf16.mxu0 %v2144_v18  ;;  %2401 = vmatprep.subr.bf16.mxu1 %v2400_v19  ;;  %v2418_v18 = vpack.c.bf16 %v966_v11, %v962_v41  ;;  %v968_v19 = vld [vmem:[#allocation8 + $0xf80] sm:$0xff]  ;;  %v2164_v22 = vpack.c.bf16 %v973_v14, %v969_v12  ;;  %v2420_v23 = vpack.c.bf16 %v975_v16, %v971_v15  ;;  %v1582_v11 = vld [vmem:[%s3085_s5 + $0x20] sm:$0xff]  ;;  %v1583_v12 = vld [vmem:[%s3085_s5 + $0x28] sm:$0xff] }
 0x1f7   :  { %v1614_v16 = vld [vmem:[%s3085_s5 + $0x120] sm:$0xff]  ;;  %v1607_v55 = vld [vmem:[%s3085_s5 + $0xe8] sm:$0xff] }
 0x1f9   :  { %2147 = vmatpush1.bf16.msra.mxu0 %v2146_v27  ;;  %2403 = vmatpush1.bf16.msra.mxu1 %v2402_v28  ;;  %v977_v27 = vld [vmem:[#allocation8 + $0xfc8] sm:$0xff] }
 0x1fa   :  { %2149 = vmatprep.subr.bf16.mxu0 %v2148_v25  ;;  %2405 = vmatprep.subr.bf16.mxu1 %v2404_v35  ;;  %v981_v28 = vld [vmem:[#allocation8 + $0xfe8] sm:$0xff]  ;;  %v2166_v25 = vpack.c.bf16 %v972_v20, %v968_v19  ;;  %v2422_v35 = vpack.c.bf16 %v974_v26, %v970_v24  ;;  %v1632_v20 = vld [vmem:[%s3085_s5 + $0x1b0] sm:$0xff] }
 0x1fb   :  { %v2168_v36 = vpack.c.bf16 %v981_v28, %v977_v27  ;;  %v1601_v19 = vld [vmem:[%s3085_s5 + $0xb8] sm:$0xff]  ;;  %v1584_v24 = vld [vmem:[%s3085_s5 + $0x30] sm:$0xff]  ;;  %v2472_v28 = vpack.c.bf16 %v1633_v21, %v1632_v20 }
 0x1fc   :  { %v1585_v26 = vld [vmem:[%s3085_s5 + $0x38] sm:$0xff]  ;;  %v984_v21 = vld [vmem:[#allocation10] sm:$0xf] }
 0x1fd   :  { %2151 = vmatpush1.bf16.msra.mxu0 %v2150_v39  ;;  %2407 = vmatpush1.bf16.msra.mxu1 %v2406_v40  ;;  %v982_v39 = vld [vmem:[#allocation8 + $0xff0] sm:$0xff]  ;;  %v2442_v34 = vpack.c.bf16 %v1585_v26, %v1584_v24  ;;  %v993_v24 = vrot.slane %v984_v21, %v142_v60  ;;  %v1001_v26 = vrot.slane %v984_v21, %v150_v62 }
 0x1fe   :  { %2153 = vmatprep.subr.bf16.mxu0 %v2152_v45  ;;  %2409 = vmatprep.subr.bf16.mxu1 %v2408_v46  ;;  %v1594_v40 = vld [vmem:[%s3085_s5 + $0x80] sm:$0xff]  ;;  %v2170_v45 = vpack.c.bf16 %v980_v33, %v976_v31  ;;  %v2426_v46 = vpack.c.bf16 %v982_v39, %v978_v38  ;;  %v1635_v33 = vld [vmem:[%s3085_s5 + $0x1c8] sm:$0xff] }
 0x1ff   :  { %v2428_v49 = vpack.c.bf16 %v1595_v43, %v1594_v40  ;;  %v1634_v31 = vld [vmem:[%s3085_s5 + $0x1c0] sm:$0xff]  ;;  %v1587_v38 = vld [vmem:[%s3085_s5 + $0x48] sm:$0xff] }
 0x200   :  { %v2476_v40 = vpack.c.bf16 %v1635_v33, %v1634_v31  ;;  %v1618_v43 = vld [vmem:[%s3085_s5 + $0x140] sm:$0xff] }
 0x201   :  { %2155 = vmatpush1.bf16.msra.mxu0 %v2154_v52  ;;  %2411 = vmatpush1.bf16.msra.mxu1 %v2410_v53  ;;  %v1611_v52 = vld [vmem:[%s3085_s5 + $0x108] sm:$0xff]  ;;  %v1596_v53 = vld [vmem:[%s3085_s5 + $0x90] sm:$0xff]  ;;  %v2478_v48 = vpack.c.bf16 %v1619_v44, %v1618_v43 }
 0x202   :  { %2157 = vmatprep.subr.bf16.mxu0 %v2156_v59  ;;  %2413 = vmatprep.subr.bf16.mxu1 %v2412_v56  ;;  %v2430_v59 = vpack.c.bf16 %v1579_v47, %v1578_v42  ;;  %v2462_v56 = vpack.c.bf16 %v1611_v52, %v1610_v51  ;;  %v2432_v2 = vpack.c.bf16 %v1597_v32, %v1596_v53  ;;  %v1637_v42 = vld [vmem:[%s3085_s5 + $0x1d8] sm:$0xff]  ;;  %v1620_v53 = vld [vmem:[%s3085_s5 + $0x150] sm:$0xff] }
 0x203   :  { %v1621_v32 = vld [vmem:[%s3085_s5 + $0x158] sm:$0xff] }
 0x205   :  { %2159 = vmatpush1.bf16.msra.mxu0 %v2158_v5  ;;  %2415 = vmatpush1.bf16.msra.mxu1 %v2414_v6  ;;  %v1613_v5 = vld [vmem:[%s3085_s5 + $0x118] sm:$0xff]  ;;  %v1598_v6 = vld [vmem:[%s3085_s5 + $0xa0] sm:$0xff] }
 0x206   :  { %2161 = vmatprep.subr.bf16.mxu0 %v2160_v8  ;;  %2417 = vmatprep.subr.bf16.mxu1 %v2416_v9  ;;  %v1631_v8 = vld [vmem:[%s3085_s5 + $0x1a8] sm:$0xff]  ;;  %v2434_v9 = vpack.c.bf16 %v1581_v61, %v1580_v13  ;;  %v2466_v41 = vpack.c.bf16 %v1613_v5, %v1612_v4  ;;  %v2436_v14 = vpack.c.bf16 %v1599_v7, %v1598_v6  ;;  %v1622_v5 = vld [vmem:[%s3085_s5 + $0x160] sm:$0xff] }
 0x207   :  { %v2468_v15 = vpack.c.bf16 %v1631_v8, %v1630_v0  ;;  %v2482_v61 = vpack.c.bf16 %v1621_v32, %v1620_v53  ;;  %v1591_v4 = vld [vmem:[%s3085_s5 + $0x68] sm:$0xff]  ;;  %v1608_v8 = vld [vmem:[%s3085_s5 + $0xf0] sm:$0xff] }
 0x208   :  { %v1623_v7 = vld [vmem:[%s3085_s5 + $0x168] sm:$0xff] }
 0x209   :  { %2163 = vmatpush1.bf16.msra.mxu0 %v2162_v17  ;;  %2419 = vmatpush1.bf16.msra.mxu1 %v2418_v18  ;;  %v1615_v17 = vld [vmem:[%s3085_s5 + $0x128] sm:$0xff]  ;;  %v1600_v18 = vld [vmem:[%s3085_s5 + $0xb0] sm:$0xff]  ;;  %v2486_v0 = vpack.c.bf16 %v1623_v7, %v1622_v5 }
 0x20a   :  { %2165 = vmatprep.subr.bf16.mxu0 %v2164_v22  ;;  %2421 = vmatprep.subr.bf16.mxu1 %v2420_v23  ;;  %v2438_v22 = vpack.c.bf16 %v1583_v12, %v1582_v11  ;;  %v2470_v23 = vpack.c.bf16 %v1615_v17, %v1614_v16  ;;  %v2440_v27 = vpack.c.bf16 %v1601_v19, %v1600_v18  ;;  %v1641_v12 = vld [vmem:[%s3085_s5 + $0x1f8] sm:$0xff]  ;;  %v1624_v18 = vld [vmem:[%s3085_s5 + $0x170] sm:$0xff] }
 0x20b   :  { %v1625_v19 = vld [vmem:[%s3085_s5 + $0x178] sm:$0xff] }
 0x20c   :  { %v2490_v20 = vpack.c.bf16 %v1625_v19, %v1624_v18 }
 0x20d   :  { %2167 = vmatpush1.bf16.msra.mxu0 %v2166_v25  ;;  %2423 = vmatpush1.bf16.msra.mxu1 %v2422_v35  ;;  %v1602_v25 = vld [vmem:[%s3085_s5 + $0xc0] sm:$0xff]  ;;  %v1603_v35 = vld [vmem:[%s3085_s5 + $0xc8] sm:$0xff] }
 0x20e   :  { %2169 = vmatprep.subr.bf16.mxu0 %v2168_v36  ;;  %2425 = vmatprep.subr.bf16.mxu1 %v2424_v37  ;;  %v2474_v36 = vpack.c.bf16 %v1617_v30, %v1616_v29  ;;  %v1586_v37 = vld [vmem:[%s3085_s5 + $0x40] sm:$0xff]  ;;  %v2444_v39 = vpack.c.bf16 %v1603_v35, %v1602_v25 }
 0x20f   :  { %v2446_v47 = vpack.c.bf16 %v1587_v38, %v1586_v37 }
 0x211   :  { %2171 = vmatpush1.bf16.msra.mxu0 %v2170_v45  ;;  %2427 = vmatpush1.bf16.msra.mxu1 %v2426_v46  ;;  %v1605_v45 = vld [vmem:[%s3085_s5 + $0xd8] sm:$0xff]  ;;  %v1636_v46 = vld [vmem:[%s3085_s5 + $0x1d0] sm:$0xff] }
 0x212   :  { %2429 = vmatprep.subr.bf16.mxu0 %v2428_v49  ;;  %2461 = vmatprep.subr.bf16.mxu1 %v2460_v50  ;;  %v1588_v49 = vld [vmem:[%s3085_s5 + $0x50] sm:$0xff]  ;;  %v1589_v50 = vld [vmem:[%s3085_s5 + $0x58] sm:$0xff]  ;;  %v2448_v51 = vpack.c.bf16 %v1605_v45, %v1604_v1  ;;  %v2480_v52 = vpack.c.bf16 %v1637_v42, %v1636_v46 }
 0x213   :  { %v2450_v13 = vpack.c.bf16 %v1589_v50, %v1588_v49 }
 0x214   :  { %1284 = vmatmul.mubr.f32.vlgmr.msra.gmra.mrb[4].mxu0 %v470_v63  ;;  %1568 = vmatmul.mubr.f32.vlgmr.msra.gmra.mrb[4].mxu1 %v470_v63  ;;  %v2452_v63 = vpack.c.bf16 %v1607_v55, %v1606_v54 }
 0x215   :  { %2431 = vmatpush3.bf16.msra.mxu0 %v2430_v59  ;;  %2463 = vmatpush3.bf16.msra.mxu1 %v2462_v56  ;;  %v1638_v59 = vld [vmem:[%s3085_s5 + $0x1e0] sm:$0xff]  ;;  %v1639_v56 = vld [vmem:[%s3085_s5 + $0x1e8] sm:$0xff] }
 0x216   :  { %2433 = vmatprep.subr.bf16.mxu0 %v2432_v2  ;;  %2465 = vmatprep.subr.bf16.mxu1 %v2464_v3  ;;  %v2484_v2 = vpack.c.bf16 %v1639_v56, %v1638_v59  ;;  %v1590_v3 = vld [vmem:[%s3085_s5 + $0x60] sm:$0xff] }
 0x217   :  { %v2454_v6 = vpack.c.bf16 %v1591_v4, %v1590_v3 }
 0x219   :  { %2435 = vmatpush3.bf16.msra.mxu0 %v2434_v9  ;;  %2467 = vmatpush3.bf16.msra.mxu1 %v2466_v41  ;;  %v1609_v9 = vld [vmem:[%s3085_s5 + $0xf8] sm:$0xff]  ;;  %v1640_v41 = vld [vmem:[%s3085_s5 + $0x1f0] sm:$0xff] }
 0x21a   :  { %2437 = vmatprep.subr.bf16.mxu0 %v2436_v14  ;;  %2469 = vmatprep.subr.bf16.mxu1 %v2468_v15  ;;  %v2456_v11 = vpack.c.bf16 %v1609_v9, %v1608_v8  ;;  %v1592_v14 = vld [vmem:[%s3085_s5 + $0x70] sm:$0xff]  ;;  %v1593_v15 = vld [vmem:[%s3085_s5 + $0x78] sm:$0xff]  ;;  %v2488_v16 = vpack.c.bf16 %v1641_v12, %v1640_v41  ;;  %s2696_s5 = smov [#allocation13]  }
 0x21b   :  { %v2458_v17 = vpack.c.bf16 %v1593_v15, %v1592_v14  ;;  %s1797_s12 = sshll.u32 %s2696_s5, 4  ;;  %s1798_s12 = int_to_ptr.vmem [resolvable:$true] %s1797_s12 }
 0x21c   :  { %s2653_s13 = scalar_lea.vmem %s1798_s12, 128  ;;  %p2658_p7 = scmp.lt.s32.totalorder %s1798_s12, %s1798_s12 }
 0x21d   :  { %2439 = vmatpush3.bf16.msra.mxu0 %v2438_v22  ;;  %2471 = vmatpush3.bf16.msra.mxu1 %v2470_v23  ;;  %v989_v22 = vrot.slane %v984_v21, %v138_v58  ;;  %v997_v23 = vrot.slane %v984_v21, %v146_v10  ;;  %p2654_p6 = scmp.ne.s32.totalorder %s1798_s12, %s2653_s13  ;;  %p2659_p8 = scmp.lt.s32.totalorder %s2653_s13, %s2653_s13 }
 0x21e   :  { %2441 = vmatprep.subr.bf16.mxu0 %v2440_v27  ;;  %2473 = vmatprep.subr.bf16.mxu1 %v2472_v28 }
 0x21f   :  { %p2660_p9 = por %p2659_p8, %p2658_p7 }
 0x221   :  { %2443 = vmatpush3.bf16.msra.mxu0 %v2442_v34  ;;  %2475 = vmatpush3.bf16.msra.mxu1 %v2474_v36  ;;  %p2661_p10 = pnand %p2660_p9, %p2654_p6 }
 0x222   :  { %2445 = vmatprep.subr.bf16.mxu0 %v2444_v39  ;;  %2477 = vmatprep.subr.bf16.mxu1 %v2476_v40 }
 0x225   :  { %2447 = vmatpush3.bf16.msra.mxu0 %v2446_v47  ;;  %2479 = vmatpush3.bf16.msra.mxu1 %v2478_v48 }
 0x226   :  { %2449 = vmatprep.subr.bf16.mxu0 %v2448_v51  ;;  %2481 = vmatprep.subr.bf16.mxu1 %v2480_v52 }
 0x229   :  { %2451 = vmatpush3.bf16.msra.mxu0 %v2450_v13  ;;  %2483 = vmatpush3.bf16.msra.mxu1 %v2482_v61 }
 0x22a   :  { %2453 = vmatprep.subr.bf16.mxu0 %v2452_v63  ;;  %2485 = vmatprep.subr.bf16.mxu1 %v2484_v2 }
 0x22d   :  { %2455 = vmatpush3.bf16.msra.mxu0 %v2454_v6  ;;  %2487 = vmatpush3.bf16.msra.mxu1 %v2486_v0 }
 0x22e   :  { %2457 = vmatprep.subr.bf16.mxu0 %v2456_v11  ;;  %2489 = vmatprep.subr.bf16.mxu1 %v2488_v16 }
 0x231   :  { %2459 = vmatpush3.bf16.msra.mxu0 %v2458_v17  ;;  %2491 = vmatpush3.bf16.msra.mxu1 %v2490_v20 }
 0x2e7   :  { %v1285_v27 = vpop.f32.mrb[4].mxu0  ;;  %v1569_v28 = vpop.f32.mrb[4].mxu1 }
 0x2e8   :  { %v2492_v29 = vadd.f32 %v1285_v27, %v989_v22  ;;  %v2494_v30 = vadd.f32 %v1569_v28, %v997_v23  ;;  %v1287_v25 = vpop.f32.mrb[5].mxu0  ;;  %v1571_v35 = vpop.f32.mrb[5].mxu1 }
 0x2e9   :  { %v2493_v31 = vadd.f32 %v1287_v25, %v993_v24  ;;  %v2495_v33 = vadd.f32 %v1571_v35, %v1001_v26 }
 0x2ea   :  { %v1574_v58 = vmax.f32 %v2492_v29, 0.0  ;;  %v1576_v37 = vmax.f32 %v2494_v30, 0.0 }
 0x2eb   :  { %v1575_v34 = vmax.f32 %v2493_v31, 0.0  ;;  %v1577_v36 = vmax.f32 %v2495_v33, 0.0 }
 0x2ed   :  { %1713 = vmatprep.mubr.f32.mxu0 %v1575_v34  ;;  %1783 = vmatprep.mubr.f32.mxu1 %v1577_v36 }
 0x2ee   :  { %1714 = vmatmul.mubr.f32.vlgmr.msra.gmra.mrb[6].mxu0 %v1574_v58  ;;  %1784 = vmatmul.mubr.f32.vlgmr.msra.gmra.mrb[6].mxu1 %v1576_v37 }
 0x3c1   :  { %v1846_v60 = vpop.f32.mrb[6].mxu0  ;;  %v1881_v10 = vpop.f32.mrb[6].mxu1 }
 0x3c2   :  { %v1847_v62 = vpop.f32.mrb[7].mxu0  ;;  %v1882_v38 = vpop.f32.mrb[7].mxu1 }
 0x3c3   :  { %v1848_v39 = vadd.f32 %v1847_v62, %v1846_v60  ;;  %v1883_v40 = vadd.f32 %v1882_v38, %v1881_v10 }
 0x3c5   :  { %v1716_v43 = vadd.f32 %v1848_v39, %v1813_v57 }
 0x3c7   :  { %v1786_v44 = vadd.f32 %v1883_v40, %v1716_v43 }
 0x3c9   :  { %1790 = vst.msk [vmem:[#allocation13] sm:$0xff] %vm1789_vm1, %v1786_v44 }
 0x3ca   :  { %2664 = shalt.err (!%p2661_p10)
}
 0x3cb   :  { %s2665_s8 = scalar_lea.hbm %s3087_s7, 128 }
 0x3cc   :  { %p2666_p11 = scmp.ne.s32.totalorder %s3087_s7, %s2665_s8  ;;  %p2669_p12 = scmp.lt.u32.totalorder %s2665_s8, %s3087_s7 }
 0x3ce   :  { %p2671_p13 = pnand %p2669_p12, %p2666_p11 }
 0x3d0   :  { %2674 = shalt.err (!%p2671_p13)
}
 0x3d1   :  { %1800 = dma.vmem_to_hbm [thread:$0]  %s1798_s12, 128, %s3087_s7, [#allocation4]  }
 0x3d2   :  { %2683 = dma.done.wait [#allocation4], 128  }
 0x3d3   :  { %2684 = vsyncadd [#allocation4], 4294967168 }
 0x3d4   :  { %1804 = vsyncpa [#allocation3], 1 }
 0x3d5   :  { %1805 = vsyncpa [#allocation6], 1 }
 0x3d6   :  { %1806 = vsyncpa [#allocation9], 1 }
 0x3d7   :  { %1807 = vsyncpa [#allocation12], 1 }
 0x3d8   :  { %1808 = vsyncpa [#allocation4], 1 }

</bundles_post_ra>
